<compile_context>
chip_gen: v7x
topology: tpu7x:2x2x1
jax: 0.10.0
libtpu: 0.0.40
codegen_flags: <defaults>
</compile_context>

<pallas_src>
import functools
import math

import jax
import jax.numpy as jnp
from jax.experimental import pallas as pl
from jax.experimental.pallas import tpu as pltpu


_PAR1 = pltpu.CompilerParams(dimension_semantics=("parallel",))


# ------------------------------ small helpers ------------------------------ #

def _round_up(x, m):
    return (x + m - 1) // m * m


def _pad_seq_len(n):
    # Sublane-align short sequences, lane-align long ones (197 -> 256).
    return _round_up(n, 8) if n <= 128 else _round_up(n, 128)


def _ln_f32(x, g, b):
    mean = jnp.mean(x, axis=-1, keepdims=True)
    xc = x - mean
    var = jnp.mean(xc * xc, axis=-1, keepdims=True)
    return xc * jax.lax.rsqrt(var + 1e-5) * g + b


def _wspec(shape):
    n = len(shape)
    return pl.BlockSpec(shape, lambda b: (0,) * n)


def _attn_outproj(q, k, v, wo_ref, *, nhead, kv_len):
    """Multi-head attention fused with the output projection.

    q: (Lq, D) f32, k/v: (Lk, D) f32, wo_ref: (nhead, hd, D) bf16 ref.
    Scale is already folded into the q projection.  Returns (Lq, D) f32
    (without the out-proj bias).  Per-head contexts are never materialized
    in VMEM scratch — they are folded into the out-projection and accumulated
    in registers, so the only store is the caller's final dense tile store.
    """
    Lq, D = q.shape
    Lk = k.shape[0]
    hd = D // nhead
    qb = q.astype(jnp.bfloat16)
    kb = k.astype(jnp.bfloat16)
    vb = v.astype(jnp.bfloat16)
    if kv_len < Lk:  # static: only traced when the key dim was padded
        key_mask = jax.lax.broadcasted_iota(jnp.int32, (Lq, Lk), 1) < kv_len
    y = jnp.zeros((Lq, D), jnp.float32)
    for h in range(nhead):                      # static unroll; nhead is small
        sl = slice(h * hd, (h + 1) * hd)
        s = jax.lax.dot_general(qb[:, sl], kb[:, sl],
                                (((1,), (1,)), ((), ())),
                                preferred_element_type=jnp.float32)
        if kv_len < Lk:
            s = jnp.where(key_mask, s, -jnp.inf)
        s = s - jnp.max(s, axis=-1, keepdims=True)
        p = jnp.exp(s)
        p = p * pl.reciprocal(jnp.sum(p, axis=-1, keepdims=True), approx=True)
        o_h = jnp.dot(p.astype(jnp.bfloat16), vb[:, sl],
                      preferred_element_type=jnp.float32)
        y = y + jnp.dot(o_h.astype(jnp.bfloat16), wo_ref[h],
                        preferred_element_type=jnp.float32)
    return y


# --------------------------------- kernels --------------------------------- #

def _self_block_kernel(src_ref, pos_ref, ln1g, ln1b, wqk, bqk, wv, bv,
                       wo, bo, ln2g, ln2b, w1, b1, w2, b2, o_ref,
                       *, nhead, kv_len):
    """Whole pre-norm self-attention block + FFN for one batch element."""
    D = src_ref.shape[-1]
    x = src_ref[0].astype(jnp.float32)                      # (S, D)
    src2 = _ln_f32(x, ln1g[...], ln1b[...])
    qk_in = (src2 + pos_ref[0].astype(jnp.float32)).astype(jnp.bfloat16)
    qk = jnp.dot(qk_in, wqk[...],
                 preferred_element_type=jnp.float32) + bqk[...]   # (S, 2D)
    v = jnp.dot(src2.astype(jnp.bfloat16), wv[...],
                preferred_element_type=jnp.float32) + bv[...]     # (S, D)
    y = _attn_outproj(qk[:, :D], qk[:, D:], v, wo,
                      nhead=nhead, kv_len=kv_len) + bo[...]
    s1 = x + y                                               # attn residual
    z = _ln_f32(s1, ln2g[...], ln2b[...])
    hid = jnp.maximum(jnp.dot(z.astype(jnp.bfloat16), w1[...],
                              preferred_element_type=jnp.float32) + b1[...],
                      0.0)
    ffn = jnp.dot(hid.astype(jnp.bfloat16), w2[...],
                  preferred_element_type=jnp.float32) + b2[...]
    o_ref[0] = (s1 + ffn).astype(o_ref.dtype)                # single dense store


def _cross_block_kernel(pc_ref, kvsrc_ref, ln1g, ln1b, wq, bq, wkv, bkv,
                        wo, bo, ln2g, ln2b, w1, b1, w2, b2, o_ref,
                        *, nhead, kv_len):
    """Whole cross-attention block + FFN for one batch element."""
    D = pc_ref.shape[-1]
    pc = pc_ref[0].astype(jnp.float32)                       # (Lq, D)
    res = _ln_f32(pc, ln1g[...], ln1b[...])                  # residual base
    # torch semantics: query is the raw (un-normalized) pc_feat.
    q = jnp.dot(pc.astype(jnp.bfloat16), wq[...],
                preferred_element_type=jnp.float32) + bq[...]
    kv = jnp.dot(kvsrc_ref[0].astype(jnp.bfloat16), wkv[...],
                 preferred_element_type=jnp.float32) + bkv[...]   # (Lk, 2D)
    y = _attn_outproj(q, kv[:, :D], kv[:, D:], wo,
                      nhead=nhead, kv_len=kv_len) + bo[...]
    c1 = res + y
    z = _ln_f32(c1, ln2g[...], ln2b[...])
    hid = jnp.maximum(jnp.dot(z.astype(jnp.bfloat16), w1[...],
                              preferred_element_type=jnp.float32) + b1[...],
                      0.0)
    ffn = jnp.dot(hid.astype(jnp.bfloat16), w2[...],
                  preferred_element_type=jnp.float32) + b2[...]
    o_ref[0] = (c1 + ffn).astype(o_ref.dtype)


# --------------------------------- wrappers --------------------------------- #

def self_block(src_b, pos_b, p, nhead, kv_len):
    B, S, D = src_b.shape
    hd = D // nhead
    dff = p["w1"].shape[1]
    kernel = functools.partial(_self_block_kernel, nhead=nhead, kv_len=kv_len)
    return pl.pallas_call(
        kernel,
        out_shape=jax.ShapeDtypeStruct((B, S, D), jnp.float32),
        grid=(B,),
        in_specs=[
            pl.BlockSpec((1, S, D), lambda b: (b, 0, 0)),     # src
            pl.BlockSpec((1, S, D), lambda b: (b, 0, 0)),     # pos
            _wspec((1, D)), _wspec((1, D)),                   # ln1 g/b
            _wspec((D, 2 * D)), _wspec((1, 2 * D)),           # W_qk (q pre-scaled)
            _wspec((D, D)), _wspec((1, D)),                   # W_v
            _wspec((nhead, hd, D)), _wspec((1, D)),           # W_o head-major
            _wspec((1, D)), _wspec((1, D)),                   # ln2 g/b
            _wspec((D, dff)), _wspec((1, dff)),               # linear1
            _wspec((dff, D)), _wspec((1, D)),                 # linear2
        ],
        out_specs=pl.BlockSpec((1, S, D), lambda b: (b, 0, 0)),
        compiler_params=_PAR1,
    )(src_b, pos_b,
      p["norm1_g"], p["norm1_b"],
      p["self_wqk"], p["self_bqk"], p["self_wv"], p["self_bv"],
      p["self_wo"], p["self_bo"],
      p["norm2_g"], p["norm2_b"],
      p["w1"], p["b1"], p["w2"], p["b2"])


def cross_block(pc_b, kv_src_b, p, nhead, kv_len):
    B, Lq, D = pc_b.shape
    Lk = kv_src_b.shape[1]
    hd = D // nhead
    dff = p["cw1"].shape[1]
    kernel = functools.partial(_cross_block_kernel, nhead=nhead, kv_len=kv_len)
    return pl.pallas_call(
        kernel,
        out_shape=jax.ShapeDtypeStruct((B, Lq, D), jnp.float32),
        grid=(B,),
        in_specs=[
            pl.BlockSpec((1, Lq, D), lambda b: (b, 0, 0)),    # pc_feat
            pl.BlockSpec((1, Lk, D), lambda b: (b, 0, 0)),    # kv source rows
            _wspec((1, D)), _wspec((1, D)),                   # cross ln1 g/b
            _wspec((D, D)), _wspec((1, D)),                   # W_q (pre-scaled)
            _wspec((D, 2 * D)), _wspec((1, 2 * D)),           # W_kv
            _wspec((nhead, hd, D)), _wspec((1, D)),           # W_o head-major
            _wspec((1, D)), _wspec((1, D)),                   # cross ln2 g/b
            _wspec((D, dff)), _wspec((1, dff)),               # cross linear1
            _wspec((dff, D)), _wspec((1, D)),                 # cross linear2
        ],
        out_specs=pl.BlockSpec((1, Lq, D), lambda b: (b, 0, 0)),
        compiler_params=_PAR1,
    )(pc_b, kv_src_b,
      p["cross_norm1_g"], p["cross_norm1_b"],
      p["cross_wq"], p["cross_bq"], p["cross_wkv"], p["cross_bkv"],
      p["cross_wo"], p["cross_bo"],
      p["cross_norm2_g"], p["cross_norm2_b"],
      p["cw1"], p["cb1"], p["cw2"], p["cb2"])


# ------------------------------- forward (pre) ------------------------------- #

def forward(src, pc_feat, pos, p, nhead):
    # forward_pre, src_mask=None, key_padding_mask=None, return_attn_weights=False
    S, B, D = src.shape
    Lq = pc_feat.shape[0]
    if pos is None:
        pos = jnp.zeros_like(src)

    # Batch-first internal layout (one batch element per grid step).
    # TODO(synk): absorb these relayouts into the kernel DMAs for large shapes.
    src_b = jnp.transpose(src, (1, 0, 2))        # (B, S, D)
    pos_b = jnp.transpose(pos, (1, 0, 2))
    pc_b = jnp.transpose(pc_feat, (1, 0, 2))     # (B, Lq, D)

    # --- self block (LN1 + MHA + residual + LN2 + FFN + residual), 1 launch ---
    S_pad = _pad_seq_len(S)
    if S_pad != S:
        padcfg = ((0, 0), (0, S_pad - S), (0, 0))
        src_b = jnp.pad(src_b, padcfg)
        pos_b = jnp.pad(pos_b, padcfg)
    new_src_b = self_block(src_b, pos_b, p, nhead, kv_len=S)
    if S_pad != S:
        new_src_b = new_src_b[:, :S, :]

    # --- cross block, 1 launch; kv = src[:197] padded to a lane-friendly Lk ---
    Sk = min(197, S)
    Lk_pad = _pad_seq_len(Sk)
    kv_src = new_src_b[:, :Sk, :]
    if Lk_pad != Sk:
        kv_src = jnp.pad(kv_src, ((0, 0), (0, Lk_pad - Sk), (0, 0)))

    Lq_pad = _pad_seq_len(Lq)
    pc_in = pc_b
    if Lq_pad != Lq:
        pc_in = jnp.pad(pc_b, ((0, 0), (0, Lq_pad - Lq), (0, 0)))
    cross_b = cross_block(pc_in, kv_src, p, nhead, kv_len=Sk)
    if Lq_pad != Lq:
        cross_b = cross_b[:, :Lq, :]

    return jnp.transpose(new_src_b, (1, 0, 2)), jnp.transpose(cross_b, (1, 0, 2))


# ------------------------------ param preparation ---------------------------- #

def prepare_params(raw, d_model, nhead):
    """Pre-transpose to (Din, Dout), pre-cast matmul weights to bf16, fold the
    1/sqrt(head_dim) attention scale into the q projections, and store the
    out-projection weights head-major (nhead, hd, D)."""
    D = d_model
    hd = D // nhead
    scale = 1.0 / math.sqrt(hd)

    def tw(w):
        return jnp.asarray(w, jnp.float32).T.astype(jnp.bfloat16)

    def rb(b):
        return jnp.asarray(b, jnp.float32).reshape(1, -1)

    def wo_head_major(w):
        # y = attn @ W.T ; rows [h*hd:(h+1)*hd] of W.T belong to head h.
        return (jnp.asarray(w, jnp.float32).T
                .reshape(nhead, hd, D).astype(jnp.bfloat16))

    sa, ca = raw["self_attn"], raw["cross_attn"]
    sw, sb = jnp.asarray(sa["in_proj_weight"], jnp.float32), jnp.asarray(
        sa["in_proj_bias"], jnp.float32)
    cw, cb = jnp.asarray(ca["in_proj_weight"], jnp.float32), jnp.asarray(
        ca["in_proj_bias"], jnp.float32)

    self_wqk = jnp.concatenate([sw[:D] * scale, sw[D:2 * D]],
                               axis=0).T.astype(jnp.bfloat16)       # (D, 2D)
    self_bqk = jnp.concatenate([sb[:D] * scale, sb[D:2 * D]]).reshape(1, -1)

    return {
        "norm1_g": rb(raw["norm1"]["g"]), "norm1_b": rb(raw["norm1"]["b"]),
        "norm2_g": rb(raw["norm2"]["g"]), "norm2_b": rb(raw["norm2"]["b"]),
        "cross_norm1_g": rb(raw["cross_norm1"]["g"]),
        "cross_norm1_b": rb(raw["cross_norm1"]["b"]),
        "cross_norm2_g": rb(raw["cross_norm2"]["g"]),
        "cross_norm2_b": rb(raw["cross_norm2"]["b"]),
        "self_wqk": self_wqk, "self_bqk": self_bqk,
        "self_wv": tw(sw[2 * D:]), "self_bv": rb(sb[2 * D:]),
        "self_wo": wo_head_major(sa["out_proj_weight"]),
        "self_bo": rb(sa["out_proj_bias"]),
        "cross_wq": (cw[:D] * scale).T.astype(jnp.bfloat16),
        "cross_bq": (cb[:D] * scale).reshape(1, -1),
        "cross_wkv": tw(cw[D:]), "cross_bkv": rb(cb[D:]),
        "cross_wo": wo_head_major(ca["out_proj_weight"]),
        "cross_bo": rb(ca["out_proj_bias"]),
        "w1": tw(raw["linear1"]["w"]), "b1": rb(raw["linear1"]["b"]),
        "w2": tw(raw["linear2"]["w"]), "b2": rb(raw["linear2"]["b"]),
        "cw1": tw(raw["cross_linear1"]["w"]), "cb1": rb(raw["cross_linear1"]["b"]),
        "cw2": tw(raw["cross_linear2"]["w"]), "cb2": rb(raw["cross_linear2"]["b"]),
    }


# ------------------------------ pure-JAX reference --------------------------- #

def _ref_ln(x, g, b):
    m = x.mean(-1, keepdims=True)
    v = ((x - m) ** 2).mean(-1, keepdims=True)
    return (x - m) / jnp.sqrt(v + 1e-5) * g + b


def _ref_mha(query, key, value, p, nhead):
    Lq, B, D = query.shape
    Lk = key.shape[0]
    hd = D // nhead
    w, b = p["in_proj_weight"], p["in_proj_bias"]
    q = query @ w[:D].T + b[:D]
    k = key @ w[D:2 * D].T + b[D:2 * D]
    v = value @ w[2 * D:].T + b[2 * D:]
    q = q.reshape(Lq, B, nhead, hd).transpose(1, 2, 0, 3) / math.sqrt(hd)
    k = k.reshape(Lk, B, nhead, hd).transpose(1, 2, 0, 3)
    v = v.reshape(Lk, B, nhead, hd).transpose(1, 2, 0, 3)
    s = jnp.einsum("bhqd,bhkd->bhqk", q, k)
    a = jax.nn.softmax(s, axis=-1)
    o = jnp.einsum("bhqk,bhkd->bhqd", a, v)
    o = o.transpose(2, 0, 1, 3).reshape(Lq, B, D)
    return o @ p["out_proj_weight"].T + p["out_proj_bias"]


def ref_forward(src, pc_feat, pos, prm, nhead):
    s2 = _ref_ln(src, prm["norm1"]["g"], prm["norm1"]["b"])
    qk = s2 + pos
    src = src + _ref_mha(qk, qk, s2, prm["self_attn"], nhead)
    s2 = _ref_ln(src, prm["norm2"]["g"], prm["norm2"]["b"])
    h = jnp.maximum(s2 @ prm["linear1"]["w"].T + prm["linear1"]["b"], 0.0)
    src = src + (h @ prm["linear2"]["w"].T + prm["linear2"]["b"])
    kv = src[:197, :, :]
    cs = _ref_ln(pc_feat, prm["cross_norm1"]["g"], prm["cross_norm1"]["b"])
    cs = cs + _ref_mha(pc_feat, kv, kv, prm["cross_attn"], nhead)
    c2 = _ref_ln(cs, prm["cross_norm2"]["g"], prm["cross_norm2"]["b"])
    h = jnp.maximum(c2 @ prm["cross_linear1"]["w"].T + prm["cross_linear1"]["b"], 0.0)
    cs = cs + (h @ prm["cross_linear2"]["w"].T + prm["cross_linear2"]["b"])
    return src, cs


# ----------------------------------- params ---------------------------------- #

def init_params(key, d_model, nhead, dff):
    ks = jax.random.split(key, 24)
    it = iter(ks)

    def w(shape, scale=0.05):
        return (scale * jax.random.normal(next(it), shape)).astype(jnp.float32)

    def attn_p():
        return {
            "in_proj_weight": w((3 * d_model, d_model)),
            "in_proj_bias": w((3 * d_model,)),
            "out_proj_weight": w((d_model, d_model)),
            "out_proj_bias": w((d_model,)),
        }

    def lin_p(dout, din):
        return {"w": w((dout, din)), "b": w((dout,))}

    def ln_p():
        return {"g": (1.0 + w((d_model,))).astype(jnp.float32), "b": w((d_model,))}

    return {
        "self_attn": attn_p(),
        "cross_attn": attn_p(),
        "linear1": lin_p(dff, d_model),
        "linear2": lin_p(d_model, dff),
        "cross_linear1": lin_p(dff, d_model),
        "cross_linear2": lin_p(d_model, dff),
        "norm1": ln_p(),
        "norm2": ln_p(),
        "cross_norm1": ln_p(),
        "cross_norm2": ln_p(),
    }


# ------------------------------------ main ------------------------------------ #

if __name__ == "__main__":
    d_model, nhead, dff = 32, 4, 128
    S, B, Lq = 8, 2, 8

    key = jax.random.PRNGKey(0)
    kp, kx, kpc, kpos = jax.random.split(key, 4)
    raw_params = init_params(kp, d_model, nhead, dff)
    src = jax.random.normal(kx, (S, B, d_model), jnp.float32)
    pc_feat = jax.random.normal(kpc, (Lq, B, d_model), jnp.float32)
    pos = 0.1 * jax.random.normal(kpos, (S, B, d_model), jnp.float32)

    params = prepare_params(raw_params, d_model, nhead)
    fwd = jax.jit(functools.partial(forward, nhead=nhead))
    out_src, out_cross = fwd(src, pc_feat, pos, params)
    jax.block_until_ready((out_src, out_cross))

    # f32 ground-truth reference (kernels use bf16 MXU operands with f32
    # accumulation, hence the relaxed tolerance).
    with jax.default_matmul_precision("highest"):
        ref_src, ref_cross = ref_forward(src, pc_feat, pos, raw_params, nhead)
        ref_src, ref_cross = jax.block_until_ready((ref_src, ref_cross))

    assert out_src.shape == (S, B, d_model)
    assert out_cross.shape == (Lq, B, d_model)
    assert jnp.allclose(out_src, ref_src, atol=2e-2, rtol=2e-2)
    assert jnp.allclose(out_cross, ref_cross, atol=2e-2, rtol=2e-2)

    print("KERNEL_OK")
</pallas_src>

<mosaic_0001>
module attributes {stable_mosaic.version = 11 : i64} {
  func.func @_self_block_kernel(%arg0: i32, %arg1: memref<1x8x32xf32, #tpu.memory_space<vmem>>, %arg2: memref<1x8x32xf32, #tpu.memory_space<vmem>>, %arg3: memref<1x32xf32, #tpu.memory_space<vmem>>, %arg4: memref<1x32xf32, #tpu.memory_space<vmem>>, %arg5: memref<32x64xbf16, #tpu.memory_space<vmem>>, %arg6: memref<1x64xf32, #tpu.memory_space<vmem>>, %arg7: memref<32x32xbf16, #tpu.memory_space<vmem>>, %arg8: memref<1x32xf32, #tpu.memory_space<vmem>>, %arg9: memref<4x8x32xbf16, #tpu.memory_space<vmem>>, %arg10: memref<1x32xf32, #tpu.memory_space<vmem>>, %arg11: memref<1x32xf32, #tpu.memory_space<vmem>>, %arg12: memref<1x32xf32, #tpu.memory_space<vmem>>, %arg13: memref<32x128xbf16, #tpu.memory_space<vmem>>, %arg14: memref<1x128xf32, #tpu.memory_space<vmem>>, %arg15: memref<128x32xbf16, #tpu.memory_space<vmem>>, %arg16: memref<1x32xf32, #tpu.memory_space<vmem>>, %arg17: memref<1x8x32xf32, #tpu.memory_space<vmem>>) attributes {dimension_semantics = [#tpu.dimension_semantics<parallel>], iteration_bounds = array<i64: 2>, scalar_prefetch = 0 : i64, scratch_operands = 0 : i64, tpu.core_type = #tpu.core_type<tc>, window_params = [{transform_indices = @transform_0, window_bounds = array<i64: 1, 8, 32>}, {transform_indices = @transform_1, window_bounds = array<i64: 1, 8, 32>}, {pipeline_mode = #tpu.pipeline_mode<synchronous>, transform_indices = @transform_2, window_bounds = array<i64: 1, 32>}, {pipeline_mode = #tpu.pipeline_mode<synchronous>, transform_indices = @transform_3, window_bounds = array<i64: 1, 32>}, {pipeline_mode = #tpu.pipeline_mode<synchronous>, transform_indices = @transform_4, window_bounds = array<i64: 32, 64>}, {pipeline_mode = #tpu.pipeline_mode<synchronous>, transform_indices = @transform_5, window_bounds = array<i64: 1, 64>}, {pipeline_mode = #tpu.pipeline_mode<synchronous>, transform_indices = @transform_6, window_bounds = array<i64: 32, 32>}, {pipeline_mode = #tpu.pipeline_mode<synchronous>, transform_indices = @transform_7, window_bounds = array<i64: 1, 32>}, {pipeline_mode = #tpu.pipeline_mode<synchronous>, transform_indices = @transform_8, window_bounds = array<i64: 4, 8, 32>}, {pipeline_mode = #tpu.pipeline_mode<synchronous>, transform_indices = @transform_9, window_bounds = array<i64: 1, 32>}, {pipeline_mode = #tpu.pipeline_mode<synchronous>, transform_indices = @transform_10, window_bounds = array<i64: 1, 32>}, {pipeline_mode = #tpu.pipeline_mode<synchronous>, transform_indices = @transform_11, window_bounds = array<i64: 1, 32>}, {pipeline_mode = #tpu.pipeline_mode<synchronous>, transform_indices = @transform_12, window_bounds = array<i64: 32, 128>}, {pipeline_mode = #tpu.pipeline_mode<synchronous>, transform_indices = @transform_13, window_bounds = array<i64: 1, 128>}, {pipeline_mode = #tpu.pipeline_mode<synchronous>, transform_indices = @transform_14, window_bounds = array<i64: 128, 32>}, {pipeline_mode = #tpu.pipeline_mode<synchronous>, transform_indices = @transform_15, window_bounds = array<i64: 1, 32>}, {transform_indices = @transform_16, window_bounds = array<i64: 1, 8, 32>}]} {
    %c0 = arith.constant 0 : index
    %c0_0 = arith.constant 0 : index
    %c0_1 = arith.constant 0 : index
    %0 = vector.load %arg1[%c0, %c0_0, %c0_1] : memref<1x8x32xf32, #tpu.memory_space<vmem>>, vector<1x8x32xf32>
    %1 = vector.shape_cast %0 : vector<1x8x32xf32> to vector<8x32xf32>
    %c0_2 = arith.constant 0 : index
    %c0_3 = arith.constant 0 : index
    %2 = vector.load %arg3[%c0_2, %c0_3] : memref<1x32xf32, #tpu.memory_space<vmem>>, vector<1x32xf32>
    %c0_4 = arith.constant 0 : index
    %c0_5 = arith.constant 0 : index
    %3 = vector.load %arg4[%c0_4, %c0_5] : memref<1x32xf32, #tpu.memory_space<vmem>>, vector<1x32xf32>
    %cst = arith.constant dense<0.000000e+00> : vector<8xf32>
    %4 = vector.multi_reduction <add>, %1, %cst [1] : vector<8x32xf32> to vector<8xf32>
    %5 = vector.shape_cast %4 : vector<8xf32> to vector<8x1xf32>
    %cst_6 = arith.constant 3.200000e+01 : f32
    %6 = vector.broadcast %cst_6 : f32 to vector<8x1xf32>
    %7 = arith.divf %5, %6 : vector<8x1xf32>
    %8 = vector.broadcast %7 : vector<8x1xf32> to vector<8x32xf32>
    %9 = arith.subf %1, %8 : vector<8x32xf32>
    %10 = arith.mulf %9, %9 : vector<8x32xf32>
    %cst_7 = arith.constant dense<0.000000e+00> : vector<8xf32>
    %11 = vector.multi_reduction <add>, %10, %cst_7 [1] : vector<8x32xf32> to vector<8xf32>
    %12 = vector.shape_cast %11 : vector<8xf32> to vector<8x1xf32>
    %cst_8 = arith.constant 3.200000e+01 : f32
    %13 = vector.broadcast %cst_8 : f32 to vector<8x1xf32>
    %14 = arith.divf %12, %13 : vector<8x1xf32>
    %cst_9 = arith.constant 9.99999974E-6 : f32
    %15 = vector.broadcast %cst_9 : f32 to vector<8x1xf32>
    %16 = arith.addf %14, %15 : vector<8x1xf32>
    %17 = math.rsqrt %16 : vector<8x1xf32>
    %18 = vector.broadcast %17 : vector<8x1xf32> to vector<8x32xf32>
    %19 = arith.mulf %9, %18 : vector<8x32xf32>
    %20 = vector.broadcast %2 : vector<1x32xf32> to vector<8x32xf32>
    %21 = arith.mulf %19, %20 : vector<8x32xf32>
    %22 = vector.broadcast %3 : vector<1x32xf32> to vector<8x32xf32>
    %23 = arith.addf %21, %22 : vector<8x32xf32>
    %c0_10 = arith.constant 0 : index
    %c0_11 = arith.constant 0 : index
    %c0_12 = arith.constant 0 : index
    %24 = vector.load %arg2[%c0_10, %c0_11, %c0_12] : memref<1x8x32xf32, #tpu.memory_space<vmem>>, vector<1x8x32xf32>
    %25 = vector.shape_cast %24 : vector<1x8x32xf32> to vector<8x32xf32>
    %26 = arith.addf %23, %25 : vector<8x32xf32>
    %27 = arith.truncf %26 : vector<8x32xf32> to vector<8x32xbf16>
    %c0_13 = arith.constant 0 : index
    %c0_14 = arith.constant 0 : index
    %28 = vector.load %arg5[%c0_13, %c0_14] : memref<32x64xbf16, #tpu.memory_space<vmem>>, vector<32x64xbf16>
    %cst_15 = arith.constant dense<0.000000e+00> : vector<8x64xf32>
    %29 = tpu.matmul %27, %28, %cst_15 {dimension_numbers = #tpu.dot_dimension_numbers<[1], [0], [0], [1], [0, 0, 1, 1], [], []>} : vector<8x32xbf16>, vector<32x64xbf16>, vector<8x64xf32> -> vector<8x64xf32>
    %c0_16 = arith.constant 0 : index
    %c0_17 = arith.constant 0 : index
    %30 = vector.load %arg6[%c0_16, %c0_17] : memref<1x64xf32, #tpu.memory_space<vmem>>, vector<1x64xf32>
    %31 = vector.broadcast %30 : vector<1x64xf32> to vector<8x64xf32>
    %32 = arith.addf %29, %31 : vector<8x64xf32>
    %33 = arith.truncf %23 : vector<8x32xf32> to vector<8x32xbf16>
    %c0_18 = arith.constant 0 : index
    %c0_19 = arith.constant 0 : index
    %34 = vector.load %arg7[%c0_18, %c0_19] : memref<32x32xbf16, #tpu.memory_space<vmem>>, vector<32x32xbf16>
    %cst_20 = arith.constant dense<0.000000e+00> : vector<8x32xf32>
    %35 = tpu.matmul %33, %34, %cst_20 {dimension_numbers = #tpu.dot_dimension_numbers<[1], [0], [0], [1], [0, 0, 1, 1], [], []>} : vector<8x32xbf16>, vector<32x32xbf16>, vector<8x32xf32> -> vector<8x32xf32>
    %c0_21 = arith.constant 0 : index
    %c0_22 = arith.constant 0 : index
    %36 = vector.load %arg8[%c0_21, %c0_22] : memref<1x32xf32, #tpu.memory_space<vmem>>, vector<1x32xf32>
    %37 = vector.broadcast %36 : vector<1x32xf32> to vector<8x32xf32>
    %38 = arith.addf %35, %37 : vector<8x32xf32>
    %39 = vector.extract_strided_slice %32 {offsets = [0, 0], sizes = [8, 32], strides = [1, 1]} : vector<8x64xf32> to vector<8x32xf32>
    %40 = vector.extract_strided_slice %32 {offsets = [0, 32], sizes = [8, 32], strides = [1, 1]} : vector<8x64xf32> to vector<8x32xf32>
    %41 = arith.truncf %39 : vector<8x32xf32> to vector<8x32xbf16>
    %42 = arith.truncf %40 : vector<8x32xf32> to vector<8x32xbf16>
    %43 = arith.truncf %38 : vector<8x32xf32> to vector<8x32xbf16>
    %cst_23 = arith.constant 0.000000e+00 : f32
    %44 = vector.broadcast %cst_23 : f32 to vector<8x32xf32>
    %45 = vector.extract_strided_slice %41 {offsets = [0, 0], sizes = [8, 8], strides = [1, 1]} : vector<8x32xbf16> to vector<8x8xbf16>
    %46 = vector.extract_strided_slice %42 {offsets = [0, 0], sizes = [8, 8], strides = [1, 1]} : vector<8x32xbf16> to vector<8x8xbf16>
    %cst_24 = arith.constant dense<0.000000e+00> : vector<8x8xf32>
    %47 = tpu.matmul %45, %46, %cst_24 {dimension_numbers = #tpu.dot_dimension_numbers<[1], [1], [0], [0], [0, 0, 1, 0], [], []>} : vector<8x8xbf16>, vector<8x8xbf16>, vector<8x8xf32> -> vector<8x8xf32>
    %cst_25 = arith.constant dense<0xFF800000> : vector<8xf32>
    %48 = vector.multi_reduction <maximumf>, %47, %cst_25 [1] : vector<8x8xf32> to vector<8xf32>
    %49 = vector.shape_cast %48 : vector<8xf32> to vector<8x1xf32>
    %50 = vector.broadcast %49 : vector<8x1xf32> to vector<8x8xf32>
    %51 = arith.subf %47, %50 : vector<8x8xf32>
    %52 = math.exp %51 : vector<8x8xf32>
    %cst_26 = arith.constant dense<0.000000e+00> : vector<8xf32>
    %53 = vector.multi_reduction <add>, %52, %cst_26 [1] : vector<8x8xf32> to vector<8xf32>
    %54 = vector.shape_cast %53 : vector<8xf32> to vector<8x1xf32>
    %55 = tpu.reciprocal %54 {approx = true} : vector<8x1xf32> -> vector<8x1xf32>
    %56 = vector.broadcast %55 : vector<8x1xf32> to vector<8x8xf32>
    %57 = arith.mulf %52, %56 : vector<8x8xf32>
    %58 = arith.truncf %57 : vector<8x8xf32> to vector<8x8xbf16>
    %59 = vector.extract_strided_slice %43 {offsets = [0, 0], sizes = [8, 8], strides = [1, 1]} : vector<8x32xbf16> to vector<8x8xbf16>
    %cst_27 = arith.constant dense<0.000000e+00> : vector<8x8xf32>
    %60 = tpu.matmul %58, %59, %cst_27 {dimension_numbers = #tpu.dot_dimension_numbers<[1], [0], [0], [1], [0, 0, 1, 1], [], []>} : vector<8x8xbf16>, vector<8x8xbf16>, vector<8x8xf32> -> vector<8x8xf32>
    %61 = arith.truncf %60 : vector<8x8xf32> to vector<8x8xbf16>
    %c0_28 = arith.constant 0 : index
    %c0_29 = arith.constant 0 : index
    %c0_30 = arith.constant 0 : index
    %62 = vector.load %arg9[%c0_28, %c0_29, %c0_30] : memref<4x8x32xbf16, #tpu.memory_space<vmem>>, vector<1x8x32xbf16>
    %63 = vector.shape_cast %62 : vector<1x8x32xbf16> to vector<8x32xbf16>
    %cst_31 = arith.constant dense<0.000000e+00> : vector<8x32xf32>
    %64 = tpu.matmul %61, %63, %cst_31 {dimension_numbers = #tpu.dot_dimension_numbers<[1], [0], [0], [1], [0, 0, 1, 1], [], []>} : vector<8x8xbf16>, vector<8x32xbf16>, vector<8x32xf32> -> vector<8x32xf32>
    %65 = arith.addf %44, %64 : vector<8x32xf32>
    %66 = vector.extract_strided_slice %41 {offsets = [0, 8], sizes = [8, 8], strides = [1, 1]} : vector<8x32xbf16> to vector<8x8xbf16>
    %67 = vector.extract_strided_slice %42 {offsets = [0, 8], sizes = [8, 8], strides = [1, 1]} : vector<8x32xbf16> to vector<8x8xbf16>
    %cst_32 = arith.constant dense<0.000000e+00> : vector<8x8xf32>
    %68 = tpu.matmul %66, %67, %cst_32 {dimension_numbers = #tpu.dot_dimension_numbers<[1], [1], [0], [0], [0, 0, 1, 0], [], []>} : vector<8x8xbf16>, vector<8x8xbf16>, vector<8x8xf32> -> vector<8x8xf32>
    %cst_33 = arith.constant dense<0xFF800000> : vector<8xf32>
    %69 = vector.multi_reduction <maximumf>, %68, %cst_33 [1] : vector<8x8xf32> to vector<8xf32>
    %70 = vector.shape_cast %69 : vector<8xf32> to vector<8x1xf32>
    %71 = vector.broadcast %70 : vector<8x1xf32> to vector<8x8xf32>
    %72 = arith.subf %68, %71 : vector<8x8xf32>
    %73 = math.exp %72 : vector<8x8xf32>
    %cst_34 = arith.constant dense<0.000000e+00> : vector<8xf32>
    %74 = vector.multi_reduction <add>, %73, %cst_34 [1] : vector<8x8xf32> to vector<8xf32>
    %75 = vector.shape_cast %74 : vector<8xf32> to vector<8x1xf32>
    %76 = tpu.reciprocal %75 {approx = true} : vector<8x1xf32> -> vector<8x1xf32>
    %77 = vector.broadcast %76 : vector<8x1xf32> to vector<8x8xf32>
    %78 = arith.mulf %73, %77 : vector<8x8xf32>
    %79 = arith.truncf %78 : vector<8x8xf32> to vector<8x8xbf16>
    %80 = vector.extract_strided_slice %43 {offsets = [0, 8], sizes = [8, 8], strides = [1, 1]} : vector<8x32xbf16> to vector<8x8xbf16>
    %cst_35 = arith.constant dense<0.000000e+00> : vector<8x8xf32>
    %81 = tpu.matmul %79, %80, %cst_35 {dimension_numbers = #tpu.dot_dimension_numbers<[1], [0], [0], [1], [0, 0, 1, 1], [], []>} : vector<8x8xbf16>, vector<8x8xbf16>, vector<8x8xf32> -> vector<8x8xf32>
    %82 = arith.truncf %81 : vector<8x8xf32> to vector<8x8xbf16>
    %c1 = arith.constant 1 : index
    %c0_36 = arith.constant 0 : index
    %c0_37 = arith.constant 0 : index
    %83 = vector.load %arg9[%c1, %c0_36, %c0_37] : memref<4x8x32xbf16, #tpu.memory_space<vmem>>, vector<1x8x32xbf16>
    %84 = vector.shape_cast %83 : vector<1x8x32xbf16> to vector<8x32xbf16>
    %cst_38 = arith.constant dense<0.000000e+00> : vector<8x32xf32>
    %85 = tpu.matmul %82, %84, %cst_38 {dimension_numbers = #tpu.dot_dimension_numbers<[1], [0], [0], [1], [0, 0, 1, 1], [], []>} : vector<8x8xbf16>, vector<8x32xbf16>, vector<8x32xf32> -> vector<8x32xf32>
    %86 = arith.addf %65, %85 : vector<8x32xf32>
    %87 = vector.extract_strided_slice %41 {offsets = [0, 16], sizes = [8, 8], strides = [1, 1]} : vector<8x32xbf16> to vector<8x8xbf16>
    %88 = vector.extract_strided_slice %42 {offsets = [0, 16], sizes = [8, 8], strides = [1, 1]} : vector<8x32xbf16> to vector<8x8xbf16>
    %cst_39 = arith.constant dense<0.000000e+00> : vector<8x8xf32>
    %89 = tpu.matmul %87, %88, %cst_39 {dimension_numbers = #tpu.dot_dimension_numbers<[1], [1], [0], [0], [0, 0, 1, 0], [], []>} : vector<8x8xbf16>, vector<8x8xbf16>, vector<8x8xf32> -> vector<8x8xf32>
    %cst_40 = arith.constant dense<0xFF800000> : vector<8xf32>
    %90 = vector.multi_reduction <maximumf>, %89, %cst_40 [1] : vector<8x8xf32> to vector<8xf32>
    %91 = vector.shape_cast %90 : vector<8xf32> to vector<8x1xf32>
    %92 = vector.broadcast %91 : vector<8x1xf32> to vector<8x8xf32>
    %93 = arith.subf %89, %92 : vector<8x8xf32>
    %94 = math.exp %93 : vector<8x8xf32>
    %cst_41 = arith.constant dense<0.000000e+00> : vector<8xf32>
    %95 = vector.multi_reduction <add>, %94, %cst_41 [1] : vector<8x8xf32> to vector<8xf32>
    %96 = vector.shape_cast %95 : vector<8xf32> to vector<8x1xf32>
    %97 = tpu.reciprocal %96 {approx = true} : vector<8x1xf32> -> vector<8x1xf32>
    %98 = vector.broadcast %97 : vector<8x1xf32> to vector<8x8xf32>
    %99 = arith.mulf %94, %98 : vector<8x8xf32>
    %100 = arith.truncf %99 : vector<8x8xf32> to vector<8x8xbf16>
    %101 = vector.extract_strided_slice %43 {offsets = [0, 16], sizes = [8, 8], strides = [1, 1]} : vector<8x32xbf16> to vector<8x8xbf16>
    %cst_42 = arith.constant dense<0.000000e+00> : vector<8x8xf32>
    %102 = tpu.matmul %100, %101, %cst_42 {dimension_numbers = #tpu.dot_dimension_numbers<[1], [0], [0], [1], [0, 0, 1, 1], [], []>} : vector<8x8xbf16>, vector<8x8xbf16>, vector<8x8xf32> -> vector<8x8xf32>
    %103 = arith.truncf %102 : vector<8x8xf32> to vector<8x8xbf16>
    %c2 = arith.constant 2 : index
    %c0_43 = arith.constant 0 : index
    %c0_44 = arith.constant 0 : index
    %104 = vector.load %arg9[%c2, %c0_43, %c0_44] : memref<4x8x32xbf16, #tpu.memory_space<vmem>>, vector<1x8x32xbf16>
    %105 = vector.shape_cast %104 : vector<1x8x32xbf16> to vector<8x32xbf16>
    %cst_45 = arith.constant dense<0.000000e+00> : vector<8x32xf32>
    %106 = tpu.matmul %103, %105, %cst_45 {dimension_numbers = #tpu.dot_dimension_numbers<[1], [0], [0], [1], [0, 0, 1, 1], [], []>} : vector<8x8xbf16>, vector<8x32xbf16>, vector<8x32xf32> -> vector<8x32xf32>
    %107 = arith.addf %86, %106 : vector<8x32xf32>
    %108 = vector.extract_strided_slice %41 {offsets = [0, 24], sizes = [8, 8], strides = [1, 1]} : vector<8x32xbf16> to vector<8x8xbf16>
    %109 = vector.extract_strided_slice %42 {offsets = [0, 24], sizes = [8, 8], strides = [1, 1]} : vector<8x32xbf16> to vector<8x8xbf16>
    %cst_46 = arith.constant dense<0.000000e+00> : vector<8x8xf32>
    %110 = tpu.matmul %108, %109, %cst_46 {dimension_numbers = #tpu.dot_dimension_numbers<[1], [1], [0], [0], [0, 0, 1, 0], [], []>} : vector<8x8xbf16>, vector<8x8xbf16>, vector<8x8xf32> -> vector<8x8xf32>
    %cst_47 = arith.constant dense<0xFF800000> : vector<8xf32>
    %111 = vector.multi_reduction <maximumf>, %110, %cst_47 [1] : vector<8x8xf32> to vector<8xf32>
    %112 = vector.shape_cast %111 : vector<8xf32> to vector<8x1xf32>
    %113 = vector.broadcast %112 : vector<8x1xf32> to vector<8x8xf32>
    %114 = arith.subf %110, %113 : vector<8x8xf32>
    %115 = math.exp %114 : vector<8x8xf32>
    %cst_48 = arith.constant dense<0.000000e+00> : vector<8xf32>
    %116 = vector.multi_reduction <add>, %115, %cst_48 [1] : vector<8x8xf32> to vector<8xf32>
    %117 = vector.shape_cast %116 : vector<8xf32> to vector<8x1xf32>
    %118 = tpu.reciprocal %117 {approx = true} : vector<8x1xf32> -> vector<8x1xf32>
    %119 = vector.broadcast %118 : vector<8x1xf32> to vector<8x8xf32>
    %120 = arith.mulf %115, %119 : vector<8x8xf32>
    %121 = arith.truncf %120 : vector<8x8xf32> to vector<8x8xbf16>
    %122 = vector.extract_strided_slice %43 {offsets = [0, 24], sizes = [8, 8], strides = [1, 1]} : vector<8x32xbf16> to vector<8x8xbf16>
    %cst_49 = arith.constant dense<0.000000e+00> : vector<8x8xf32>
    %123 = tpu.matmul %121, %122, %cst_49 {dimension_numbers = #tpu.dot_dimension_numbers<[1], [0], [0], [1], [0, 0, 1, 1], [], []>} : vector<8x8xbf16>, vector<8x8xbf16>, vector<8x8xf32> -> vector<8x8xf32>
    %124 = arith.truncf %123 : vector<8x8xf32> to vector<8x8xbf16>
    %c3 = arith.constant 3 : index
    %c0_50 = arith.constant 0 : index
    %c0_51 = arith.constant 0 : index
    %125 = vector.load %arg9[%c3, %c0_50, %c0_51] : memref<4x8x32xbf16, #tpu.memory_space<vmem>>, vector<1x8x32xbf16>
    %126 = vector.shape_cast %125 : vector<1x8x32xbf16> to vector<8x32xbf16>
    %cst_52 = arith.constant dense<0.000000e+00> : vector<8x32xf32>
    %127 = tpu.matmul %124, %126, %cst_52 {dimension_numbers = #tpu.dot_dimension_numbers<[1], [0], [0], [1], [0, 0, 1, 1], [], []>} : vector<8x8xbf16>, vector<8x32xbf16>, vector<8x32xf32> -> vector<8x32xf32>
    %128 = arith.addf %107, %127 : vector<8x32xf32>
    %c0_53 = arith.constant 0 : index
    %c0_54 = arith.constant 0 : index
    %129 = vector.load %arg10[%c0_53, %c0_54] : memref<1x32xf32, #tpu.memory_space<vmem>>, vector<1x32xf32>
    %130 = vector.broadcast %129 : vector<1x32xf32> to vector<8x32xf32>
    %131 = arith.addf %128, %130 : vector<8x32xf32>
    %132 = arith.addf %1, %131 : vector<8x32xf32>
    %c0_55 = arith.constant 0 : index
    %c0_56 = arith.constant 0 : index
    %133 = vector.load %arg11[%c0_55, %c0_56] : memref<1x32xf32, #tpu.memory_space<vmem>>, vector<1x32xf32>
    %c0_57 = arith.constant 0 : index
    %c0_58 = arith.constant 0 : index
    %134 = vector.load %arg12[%c0_57, %c0_58] : memref<1x32xf32, #tpu.memory_space<vmem>>, vector<1x32xf32>
    %cst_59 = arith.constant dense<0.000000e+00> : vector<8xf32>
    %135 = vector.multi_reduction <add>, %132, %cst_59 [1] : vector<8x32xf32> to vector<8xf32>
    %136 = vector.shape_cast %135 : vector<8xf32> to vector<8x1xf32>
    %cst_60 = arith.constant 3.200000e+01 : f32
    %137 = vector.broadcast %cst_60 : f32 to vector<8x1xf32>
    %138 = arith.divf %136, %137 : vector<8x1xf32>
    %139 = vector.broadcast %138 : vector<8x1xf32> to vector<8x32xf32>
    %140 = arith.subf %132, %139 : vector<8x32xf32>
    %141 = arith.mulf %140, %140 : vector<8x32xf32>
    %cst_61 = arith.constant dense<0.000000e+00> : vector<8xf32>
    %142 = vector.multi_reduction <add>, %141, %cst_61 [1] : vector<8x32xf32> to vector<8xf32>
    %143 = vector.shape_cast %142 : vector<8xf32> to vector<8x1xf32>
    %cst_62 = arith.constant 3.200000e+01 : f32
    %144 = vector.broadcast %cst_62 : f32 to vector<8x1xf32>
    %145 = arith.divf %143, %144 : vector<8x1xf32>
    %cst_63 = arith.constant 9.99999974E-6 : f32
    %146 = vector.broadcast %cst_63 : f32 to vector<8x1xf32>
    %147 = arith.addf %145, %146 : vector<8x1xf32>
    %148 = math.rsqrt %147 : vector<8x1xf32>
    %149 = vector.broadcast %148 : vector<8x1xf32> to vector<8x32xf32>
    %150 = arith.mulf %140, %149 : vector<8x32xf32>
    %151 = vector.broadcast %133 : vector<1x32xf32> to vector<8x32xf32>
    %152 = arith.mulf %150, %151 : vector<8x32xf32>
    %153 = vector.broadcast %134 : vector<1x32xf32> to vector<8x32xf32>
    %154 = arith.addf %152, %153 : vector<8x32xf32>
    %155 = arith.truncf %154 : vector<8x32xf32> to vector<8x32xbf16>
    %c0_64 = arith.constant 0 : index
    %c0_65 = arith.constant 0 : index
    %156 = vector.load %arg13[%c0_64, %c0_65] : memref<32x128xbf16, #tpu.memory_space<vmem>>, vector<32x128xbf16>
    %cst_66 = arith.constant dense<0.000000e+00> : vector<8x128xf32>
    %157 = tpu.matmul %155, %156, %cst_66 {dimension_numbers = #tpu.dot_dimension_numbers<[1], [0], [0], [1], [0, 0, 1, 1], [], []>} : vector<8x32xbf16>, vector<32x128xbf16>, vector<8x128xf32> -> vector<8x128xf32>
    %c0_67 = arith.constant 0 : index
    %c0_68 = arith.constant 0 : index
    %158 = vector.load %arg14[%c0_67, %c0_68] : memref<1x128xf32, #tpu.memory_space<vmem>>, vector<1x128xf32>
    %159 = vector.broadcast %158 : vector<1x128xf32> to vector<8x128xf32>
    %160 = arith.addf %157, %159 : vector<8x128xf32>
    %cst_69 = arith.constant 0.000000e+00 : f32
    %161 = vector.broadcast %cst_69 : f32 to vector<8x128xf32>
    %162 = arith.maximumf %160, %161 : vector<8x128xf32>
    %163 = arith.truncf %162 : vector<8x128xf32> to vector<8x128xbf16>
    %c0_70 = arith.constant 0 : index
    %c0_71 = arith.constant 0 : index
    %164 = vector.load %arg15[%c0_70, %c0_71] : memref<128x32xbf16, #tpu.memory_space<vmem>>, vector<128x32xbf16>
    %cst_72 = arith.constant dense<0.000000e+00> : vector<8x32xf32>
    %165 = tpu.matmul %163, %164, %cst_72 {dimension_numbers = #tpu.dot_dimension_numbers<[1], [0], [0], [1], [0, 0, 1, 1], [], []>} : vector<8x128xbf16>, vector<128x32xbf16>, vector<8x32xf32> -> vector<8x32xf32>
    %c0_73 = arith.constant 0 : index
    %c0_74 = arith.constant 0 : index
    %166 = vector.load %arg16[%c0_73, %c0_74] : memref<1x32xf32, #tpu.memory_space<vmem>>, vector<1x32xf32>
    %167 = vector.broadcast %166 : vector<1x32xf32> to vector<8x32xf32>
    %168 = arith.addf %165, %167 : vector<8x32xf32>
    %169 = arith.addf %132, %168 : vector<8x32xf32>
    %c0_75 = arith.constant 0 : index
    %c0_76 = arith.constant 0 : index
    %c0_77 = arith.constant 0 : index
    %170 = vector.load %arg17[%c0_75, %c0_76, %c0_77] : memref<1x8x32xf32, #tpu.memory_space<vmem>>, vector<1x8x32xf32>
    %171 = vector.shape_cast %170 : vector<1x8x32xf32> to vector<8x32xf32>
    %172 = vector.shape_cast %169 : vector<8x32xf32> to vector<1x8x32xf32>
    tpu.vector_store %arg17[%c0_75, %c0_76, %c0_77], %172 {strides = array<i32>} : memref<1x8x32xf32, #tpu.memory_space<vmem>>, vector<1x8x32xf32>,
    return
  }
  func.func @transform_0(%arg0: i32) -> (i32, i32, i32) {
    %c0_i32 = arith.constant 0 : i32
    %c0_i32_0 = arith.constant 0 : i32
    %c0_i32_1 = arith.constant 0 : i32
    return %arg0, %c0_i32, %c0_i32_0 : i32, i32, i32
  }
  func.func @transform_1(%arg0: i32) -> (i32, i32, i32) {
    %c0_i32 = arith.constant 0 : i32
    %c0_i32_0 = arith.constant 0 : i32
    %c0_i32_1 = arith.constant 0 : i32
    return %arg0, %c0_i32, %c0_i32_0 : i32, i32, i32
  }
  func.func @transform_2(%arg0: i32) -> (i32, i32) {
    %c0_i32 = arith.constant 0 : i32
    %c0_i32_0 = arith.constant 0 : i32
    %c0_i32_1 = arith.constant 0 : i32
    return %c0_i32, %c0_i32_0 : i32, i32
  }
  func.func @transform_3(%arg0: i32) -> (i32, i32) {
    %c0_i32 = arith.constant 0 : i32
    %c0_i32_0 = arith.constant 0 : i32
    %c0_i32_1 = arith.constant 0 : i32
    return %c0_i32, %c0_i32_0 : i32, i32
  }
  func.func @transform_4(%arg0: i32) -> (i32, i32) {
    %c0_i32 = arith.constant 0 : i32
    %c0_i32_0 = arith.constant 0 : i32
    %c0_i32_1 = arith.constant 0 : i32
    return %c0_i32, %c0_i32_0 : i32, i32
  }
  func.func @transform_5(%arg0: i32) -> (i32, i32) {
    %c0_i32 = arith.constant 0 : i32
    %c0_i32_0 = arith.constant 0 : i32
    %c0_i32_1 = arith.constant 0 : i32
    return %c0_i32, %c0_i32_0 : i32, i32
  }
  func.func @transform_6(%arg0: i32) -> (i32, i32) {
    %c0_i32 = arith.constant 0 : i32
    %c0_i32_0 = arith.constant 0 : i32
    %c0_i32_1 = arith.constant 0 : i32
    return %c0_i32, %c0_i32_0 : i32, i32
  }
  func.func @transform_7(%arg0: i32) -> (i32, i32) {
    %c0_i32 = arith.constant 0 : i32
    %c0_i32_0 = arith.constant 0 : i32
    %c0_i32_1 = arith.constant 0 : i32
    return %c0_i32, %c0_i32_0 : i32, i32
  }
  func.func @transform_8(%arg0: i32) -> (i32, i32, i32) {
    %c0_i32 = arith.constant 0 : i32
    %c0_i32_0 = arith.constant 0 : i32
    %c0_i32_1 = arith.constant 0 : i32
    %c0_i32_2 = arith.constant 0 : i32
    return %c0_i32, %c0_i32_0, %c0_i32_1 : i32, i32, i32
  }
  func.func @transform_9(%arg0: i32) -> (i32, i32) {
    %c0_i32 = arith.constant 0 : i32
    %c0_i32_0 = arith.constant 0 : i32
    %c0_i32_1 = arith.constant 0 : i32
    return %c0_i32, %c0_i32_0 : i32, i32
  }
  func.func @transform_10(%arg0: i32) -> (i32, i32) {
    %c0_i32 = arith.constant 0 : i32
    %c0_i32_0 = arith.constant 0 : i32
    %c0_i32_1 = arith.constant 0 : i32
    return %c0_i32, %c0_i32_0 : i32, i32
  }
  func.func @transform_11(%arg0: i32) -> (i32, i32) {
    %c0_i32 = arith.constant 0 : i32
    %c0_i32_0 = arith.constant 0 : i32
    %c0_i32_1 = arith.constant 0 : i32
    return %c0_i32, %c0_i32_0 : i32, i32
  }
  func.func @transform_12(%arg0: i32) -> (i32, i32) {
    %c0_i32 = arith.constant 0 : i32
    %c0_i32_0 = arith.constant 0 : i32
    %c0_i32_1 = arith.constant 0 : i32
    return %c0_i32, %c0_i32_0 : i32, i32
  }
  func.func @transform_13(%arg0: i32) -> (i32, i32) {
    %c0_i32 = arith.constant 0 : i32
    %c0_i32_0 = arith.constant 0 : i32
    %c0_i32_1 = arith.constant 0 : i32
    return %c0_i32, %c0_i32_0 : i32, i32
  }
  func.func @transform_14(%arg0: i32) -> (i32, i32) {
    %c0_i32 = arith.constant 0 : i32
    %c0_i32_0 = arith.constant 0 : i32
    %c0_i32_1 = arith.constant 0 : i32
    return %c0_i32, %c0_i32_0 : i32, i32
  }
  func.func @transform_15(%arg0: i32) -> (i32, i32) {
    %c0_i32 = arith.constant 0 : i32
    %c0_i32_0 = arith.constant 0 : i32
    %c0_i32_1 = arith.constant 0 : i32
    return %c0_i32, %c0_i32_0 : i32, i32
  }
  func.func @transform_16(%arg0: i32) -> (i32, i32, i32) {
    %c0_i32 = arith.constant 0 : i32
    %c0_i32_0 = arith.constant 0 : i32
    %c0_i32_1 = arith.constant 0 : i32
    return %arg0, %c0_i32, %c0_i32_0 : i32, i32, i32
  }
}

module attributes {stable_mosaic.version = 11 : i64} {
  func.func @_cross_block_kernel(%arg0: i32, %arg1: memref<1x8x32xf32, #tpu.memory_space<vmem>>, %arg2: memref<1x8x32xf32, #tpu.memory_space<vmem>>, %arg3: memref<1x32xf32, #tpu.memory_space<vmem>>, %arg4: memref<1x32xf32, #tpu.memory_space<vmem>>, %arg5: memref<32x32xbf16, #tpu.memory_space<vmem>>, %arg6: memref<1x32xf32, #tpu.memory_space<vmem>>, %arg7: memref<32x64xbf16, #tpu.memory_space<vmem>>, %arg8: memref<1x64xf32, #tpu.memory_space<vmem>>, %arg9: memref<4x8x32xbf16, #tpu.memory_space<vmem>>, %arg10: memref<1x32xf32, #tpu.memory_space<vmem>>, %arg11: memref<1x32xf32, #tpu.memory_space<vmem>>, %arg12: memref<1x32xf32, #tpu.memory_space<vmem>>, %arg13: memref<32x128xbf16, #tpu.memory_space<vmem>>, %arg14: memref<1x128xf32, #tpu.memory_space<vmem>>, %arg15: memref<128x32xbf16, #tpu.memory_space<vmem>>, %arg16: memref<1x32xf32, #tpu.memory_space<vmem>>, %arg17: memref<1x8x32xf32, #tpu.memory_space<vmem>>) attributes {dimension_semantics = [#tpu.dimension_semantics<parallel>], iteration_bounds = array<i64: 2>, scalar_prefetch = 0 : i64, scratch_operands = 0 : i64, tpu.core_type = #tpu.core_type<tc>, window_params = [{transform_indices = @transform_0, window_bounds = array<i64: 1, 8, 32>}, {transform_indices = @transform_1, window_bounds = array<i64: 1, 8, 32>}, {pipeline_mode = #tpu.pipeline_mode<synchronous>, transform_indices = @transform_2, window_bounds = array<i64: 1, 32>}, {pipeline_mode = #tpu.pipeline_mode<synchronous>, transform_indices = @transform_3, window_bounds = array<i64: 1, 32>}, {pipeline_mode = #tpu.pipeline_mode<synchronous>, transform_indices = @transform_4, window_bounds = array<i64: 32, 32>}, {pipeline_mode = #tpu.pipeline_mode<synchronous>, transform_indices = @transform_5, window_bounds = array<i64: 1, 32>}, {pipeline_mode = #tpu.pipeline_mode<synchronous>, transform_indices = @transform_6, window_bounds = array<i64: 32, 64>}, {pipeline_mode = #tpu.pipeline_mode<synchronous>, transform_indices = @transform_7, window_bounds = array<i64: 1, 64>}, {pipeline_mode = #tpu.pipeline_mode<synchronous>, transform_indices = @transform_8, window_bounds = array<i64: 4, 8, 32>}, {pipeline_mode = #tpu.pipeline_mode<synchronous>, transform_indices = @transform_9, window_bounds = array<i64: 1, 32>}, {pipeline_mode = #tpu.pipeline_mode<synchronous>, transform_indices = @transform_10, window_bounds = array<i64: 1, 32>}, {pipeline_mode = #tpu.pipeline_mode<synchronous>, transform_indices = @transform_11, window_bounds = array<i64: 1, 32>}, {pipeline_mode = #tpu.pipeline_mode<synchronous>, transform_indices = @transform_12, window_bounds = array<i64: 32, 128>}, {pipeline_mode = #tpu.pipeline_mode<synchronous>, transform_indices = @transform_13, window_bounds = array<i64: 1, 128>}, {pipeline_mode = #tpu.pipeline_mode<synchronous>, transform_indices = @transform_14, window_bounds = array<i64: 128, 32>}, {pipeline_mode = #tpu.pipeline_mode<synchronous>, transform_indices = @transform_15, window_bounds = array<i64: 1, 32>}, {transform_indices = @transform_16, window_bounds = array<i64: 1, 8, 32>}]} {
    %c0 = arith.constant 0 : index
    %c0_0 = arith.constant 0 : index
    %c0_1 = arith.constant 0 : index
    %0 = vector.load %arg1[%c0, %c0_0, %c0_1] : memref<1x8x32xf32, #tpu.memory_space<vmem>>, vector<1x8x32xf32>
    %1 = vector.shape_cast %0 : vector<1x8x32xf32> to vector<8x32xf32>
    %c0_2 = arith.constant 0 : index
    %c0_3 = arith.constant 0 : index
    %2 = vector.load %arg3[%c0_2, %c0_3] : memref<1x32xf32, #tpu.memory_space<vmem>>, vector<1x32xf32>
    %c0_4 = arith.constant 0 : index
    %c0_5 = arith.constant 0 : index
    %3 = vector.load %arg4[%c0_4, %c0_5] : memref<1x32xf32, #tpu.memory_space<vmem>>, vector<1x32xf32>
    %cst = arith.constant dense<0.000000e+00> : vector<8xf32>
    %4 = vector.multi_reduction <add>, %1, %cst [1] : vector<8x32xf32> to vector<8xf32>
    %5 = vector.shape_cast %4 : vector<8xf32> to vector<8x1xf32>
    %cst_6 = arith.constant 3.200000e+01 : f32
    %6 = vector.broadcast %cst_6 : f32 to vector<8x1xf32>
    %7 = arith.divf %5, %6 : vector<8x1xf32>
    %8 = vector.broadcast %7 : vector<8x1xf32> to vector<8x32xf32>
    %9 = arith.subf %1, %8 : vector<8x32xf32>
    %10 = arith.mulf %9, %9 : vector<8x32xf32>
    %cst_7 = arith.constant dense<0.000000e+00> : vector<8xf32>
    %11 = vector.multi_reduction <add>, %10, %cst_7 [1] : vector<8x32xf32> to vector<8xf32>
    %12 = vector.shape_cast %11 : vector<8xf32> to vector<8x1xf32>
    %cst_8 = arith.constant 3.200000e+01 : f32
    %13 = vector.broadcast %cst_8 : f32 to vector<8x1xf32>
    %14 = arith.divf %12, %13 : vector<8x1xf32>
    %cst_9 = arith.constant 9.99999974E-6 : f32
    %15 = vector.broadcast %cst_9 : f32 to vector<8x1xf32>
    %16 = arith.addf %14, %15 : vector<8x1xf32>
    %17 = math.rsqrt %16 : vector<8x1xf32>
    %18 = vector.broadcast %17 : vector<8x1xf32> to vector<8x32xf32>
    %19 = arith.mulf %9, %18 : vector<8x32xf32>
    %20 = vector.broadcast %2 : vector<1x32xf32> to vector<8x32xf32>
    %21 = arith.mulf %19, %20 : vector<8x32xf32>
    %22 = vector.broadcast %3 : vector<1x32xf32> to vector<8x32xf32>
    %23 = arith.addf %21, %22 : vector<8x32xf32>
    %24 = arith.truncf %1 : vector<8x32xf32> to vector<8x32xbf16>
    %c0_10 = arith.constant 0 : index
    %c0_11 = arith.constant 0 : index
    %25 = vector.load %arg5[%c0_10, %c0_11] : memref<32x32xbf16, #tpu.memory_space<vmem>>, vector<32x32xbf16>
    %cst_12 = arith.constant dense<0.000000e+00> : vector<8x32xf32>
    %26 = tpu.matmul %24, %25, %cst_12 {dimension_numbers = #tpu.dot_dimension_numbers<[1], [0], [0], [1], [0, 0, 1, 1], [], []>} : vector<8x32xbf16>, vector<32x32xbf16>, vector<8x32xf32> -> vector<8x32xf32>
    %c0_13 = arith.constant 0 : index
    %c0_14 = arith.constant 0 : index
    %27 = vector.load %arg6[%c0_13, %c0_14] : memref<1x32xf32, #tpu.memory_space<vmem>>, vector<1x32xf32>
    %28 = vector.broadcast %27 : vector<1x32xf32> to vector<8x32xf32>
    %29 = arith.addf %26, %28 : vector<8x32xf32>
    %c0_15 = arith.constant 0 : index
    %c0_16 = arith.constant 0 : index
    %c0_17 = arith.constant 0 : index
    %30 = vector.load %arg2[%c0_15, %c0_16, %c0_17] : memref<1x8x32xf32, #tpu.memory_space<vmem>>, vector<1x8x32xf32>
    %31 = vector.shape_cast %30 : vector<1x8x32xf32> to vector<8x32xf32>
    %32 = arith.truncf %31 : vector<8x32xf32> to vector<8x32xbf16>
    %c0_18 = arith.constant 0 : index
    %c0_19 = arith.constant 0 : index
    %33 = vector.load %arg7[%c0_18, %c0_19] : memref<32x64xbf16, #tpu.memory_space<vmem>>, vector<32x64xbf16>
    %cst_20 = arith.constant dense<0.000000e+00> : vector<8x64xf32>
    %34 = tpu.matmul %32, %33, %cst_20 {dimension_numbers = #tpu.dot_dimension_numbers<[1], [0], [0], [1], [0, 0, 1, 1], [], []>} : vector<8x32xbf16>, vector<32x64xbf16>, vector<8x64xf32> -> vector<8x64xf32>
    %c0_21 = arith.constant 0 : index
    %c0_22 = arith.constant 0 : index
    %35 = vector.load %arg8[%c0_21, %c0_22] : memref<1x64xf32, #tpu.memory_space<vmem>>, vector<1x64xf32>
    %36 = vector.broadcast %35 : vector<1x64xf32> to vector<8x64xf32>
    %37 = arith.addf %34, %36 : vector<8x64xf32>
    %38 = vector.extract_strided_slice %37 {offsets = [0, 0], sizes = [8, 32], strides = [1, 1]} : vector<8x64xf32> to vector<8x32xf32>
    %39 = vector.extract_strided_slice %37 {offsets = [0, 32], sizes = [8, 32], strides = [1, 1]} : vector<8x64xf32> to vector<8x32xf32>
    %40 = arith.truncf %29 : vector<8x32xf32> to vector<8x32xbf16>
    %41 = arith.truncf %38 : vector<8x32xf32> to vector<8x32xbf16>
    %42 = arith.truncf %39 : vector<8x32xf32> to vector<8x32xbf16>
    %cst_23 = arith.constant 0.000000e+00 : f32
    %43 = vector.broadcast %cst_23 : f32 to vector<8x32xf32>
    %44 = vector.extract_strided_slice %40 {offsets = [0, 0], sizes = [8, 8], strides = [1, 1]} : vector<8x32xbf16> to vector<8x8xbf16>
    %45 = vector.extract_strided_slice %41 {offsets = [0, 0], sizes = [8, 8], strides = [1, 1]} : vector<8x32xbf16> to vector<8x8xbf16>
    %cst_24 = arith.constant dense<0.000000e+00> : vector<8x8xf32>
    %46 = tpu.matmul %44, %45, %cst_24 {dimension_numbers = #tpu.dot_dimension_numbers<[1], [1], [0], [0], [0, 0, 1, 0], [], []>} : vector<8x8xbf16>, vector<8x8xbf16>, vector<8x8xf32> -> vector<8x8xf32>
    %cst_25 = arith.constant dense<0xFF800000> : vector<8xf32>
    %47 = vector.multi_reduction <maximumf>, %46, %cst_25 [1] : vector<8x8xf32> to vector<8xf32>
    %48 = vector.shape_cast %47 : vector<8xf32> to vector<8x1xf32>
    %49 = vector.broadcast %48 : vector<8x1xf32> to vector<8x8xf32>
    %50 = arith.subf %46, %49 : vector<8x8xf32>
    %51 = math.exp %50 : vector<8x8xf32>
    %cst_26 = arith.constant dense<0.000000e+00> : vector<8xf32>
    %52 = vector.multi_reduction <add>, %51, %cst_26 [1] : vector<8x8xf32> to vector<8xf32>
    %53 = vector.shape_cast %52 : vector<8xf32> to vector<8x1xf32>
    %54 = tpu.reciprocal %53 {approx = true} : vector<8x1xf32> -> vector<8x1xf32>
    %55 = vector.broadcast %54 : vector<8x1xf32> to vector<8x8xf32>
    %56 = arith.mulf %51, %55 : vector<8x8xf32>
    %57 = arith.truncf %56 : vector<8x8xf32> to vector<8x8xbf16>
    %58 = vector.extract_strided_slice %42 {offsets = [0, 0], sizes = [8, 8], strides = [1, 1]} : vector<8x32xbf16> to vector<8x8xbf16>
    %cst_27 = arith.constant dense<0.000000e+00> : vector<8x8xf32>
    %59 = tpu.matmul %57, %58, %cst_27 {dimension_numbers = #tpu.dot_dimension_numbers<[1], [0], [0], [1], [0, 0, 1, 1], [], []>} : vector<8x8xbf16>, vector<8x8xbf16>, vector<8x8xf32> -> vector<8x8xf32>
    %60 = arith.truncf %59 : vector<8x8xf32> to vector<8x8xbf16>
    %c0_28 = arith.constant 0 : index
    %c0_29 = arith.constant 0 : index
    %c0_30 = arith.constant 0 : index
    %61 = vector.load %arg9[%c0_28, %c0_29, %c0_30] : memref<4x8x32xbf16, #tpu.memory_space<vmem>>, vector<1x8x32xbf16>
    %62 = vector.shape_cast %61 : vector<1x8x32xbf16> to vector<8x32xbf16>
    %cst_31 = arith.constant dense<0.000000e+00> : vector<8x32xf32>
    %63 = tpu.matmul %60, %62, %cst_31 {dimension_numbers = #tpu.dot_dimension_numbers<[1], [0], [0], [1], [0, 0, 1, 1], [], []>} : vector<8x8xbf16>, vector<8x32xbf16>, vector<8x32xf32> -> vector<8x32xf32>
    %64 = arith.addf %43, %63 : vector<8x32xf32>
    %65 = vector.extract_strided_slice %40 {offsets = [0, 8], sizes = [8, 8], strides = [1, 1]} : vector<8x32xbf16> to vector<8x8xbf16>
    %66 = vector.extract_strided_slice %41 {offsets = [0, 8], sizes = [8, 8], strides = [1, 1]} : vector<8x32xbf16> to vector<8x8xbf16>
    %cst_32 = arith.constant dense<0.000000e+00> : vector<8x8xf32>
    %67 = tpu.matmul %65, %66, %cst_32 {dimension_numbers = #tpu.dot_dimension_numbers<[1], [1], [0], [0], [0, 0, 1, 0], [], []>} : vector<8x8xbf16>, vector<8x8xbf16>, vector<8x8xf32> -> vector<8x8xf32>
    %cst_33 = arith.constant dense<0xFF800000> : vector<8xf32>
    %68 = vector.multi_reduction <maximumf>, %67, %cst_33 [1] : vector<8x8xf32> to vector<8xf32>
    %69 = vector.shape_cast %68 : vector<8xf32> to vector<8x1xf32>
    %70 = vector.broadcast %69 : vector<8x1xf32> to vector<8x8xf32>
    %71 = arith.subf %67, %70 : vector<8x8xf32>
    %72 = math.exp %71 : vector<8x8xf32>
    %cst_34 = arith.constant dense<0.000000e+00> : vector<8xf32>
    %73 = vector.multi_reduction <add>, %72, %cst_34 [1] : vector<8x8xf32> to vector<8xf32>
    %74 = vector.shape_cast %73 : vector<8xf32> to vector<8x1xf32>
    %75 = tpu.reciprocal %74 {approx = true} : vector<8x1xf32> -> vector<8x1xf32>
    %76 = vector.broadcast %75 : vector<8x1xf32> to vector<8x8xf32>
    %77 = arith.mulf %72, %76 : vector<8x8xf32>
    %78 = arith.truncf %77 : vector<8x8xf32> to vector<8x8xbf16>
    %79 = vector.extract_strided_slice %42 {offsets = [0, 8], sizes = [8, 8], strides = [1, 1]} : vector<8x32xbf16> to vector<8x8xbf16>
    %cst_35 = arith.constant dense<0.000000e+00> : vector<8x8xf32>
    %80 = tpu.matmul %78, %79, %cst_35 {dimension_numbers = #tpu.dot_dimension_numbers<[1], [0], [0], [1], [0, 0, 1, 1], [], []>} : vector<8x8xbf16>, vector<8x8xbf16>, vector<8x8xf32> -> vector<8x8xf32>
    %81 = arith.truncf %80 : vector<8x8xf32> to vector<8x8xbf16>
    %c1 = arith.constant 1 : index
    %c0_36 = arith.constant 0 : index
    %c0_37 = arith.constant 0 : index
    %82 = vector.load %arg9[%c1, %c0_36, %c0_37] : memref<4x8x32xbf16, #tpu.memory_space<vmem>>, vector<1x8x32xbf16>
    %83 = vector.shape_cast %82 : vector<1x8x32xbf16> to vector<8x32xbf16>
    %cst_38 = arith.constant dense<0.000000e+00> : vector<8x32xf32>
    %84 = tpu.matmul %81, %83, %cst_38 {dimension_numbers = #tpu.dot_dimension_numbers<[1], [0], [0], [1], [0, 0, 1, 1], [], []>} : vector<8x8xbf16>, vector<8x32xbf16>, vector<8x32xf32> -> vector<8x32xf32>
    %85 = arith.addf %64, %84 : vector<8x32xf32>
    %86 = vector.extract_strided_slice %40 {offsets = [0, 16], sizes = [8, 8], strides = [1, 1]} : vector<8x32xbf16> to vector<8x8xbf16>
    %87 = vector.extract_strided_slice %41 {offsets = [0, 16], sizes = [8, 8], strides = [1, 1]} : vector<8x32xbf16> to vector<8x8xbf16>
    %cst_39 = arith.constant dense<0.000000e+00> : vector<8x8xf32>
    %88 = tpu.matmul %86, %87, %cst_39 {dimension_numbers = #tpu.dot_dimension_numbers<[1], [1], [0], [0], [0, 0, 1, 0], [], []>} : vector<8x8xbf16>, vector<8x8xbf16>, vector<8x8xf32> -> vector<8x8xf32>
    %cst_40 = arith.constant dense<0xFF800000> : vector<8xf32>
    %89 = vector.multi_reduction <maximumf>, %88, %cst_40 [1] : vector<8x8xf32> to vector<8xf32>
    %90 = vector.shape_cast %89 : vector<8xf32> to vector<8x1xf32>
    %91 = vector.broadcast %90 : vector<8x1xf32> to vector<8x8xf32>
    %92 = arith.subf %88, %91 : vector<8x8xf32>
    %93 = math.exp %92 : vector<8x8xf32>
    %cst_41 = arith.constant dense<0.000000e+00> : vector<8xf32>
    %94 = vector.multi_reduction <add>, %93, %cst_41 [1] : vector<8x8xf32> to vector<8xf32>
    %95 = vector.shape_cast %94 : vector<8xf32> to vector<8x1xf32>
    %96 = tpu.reciprocal %95 {approx = true} : vector<8x1xf32> -> vector<8x1xf32>
    %97 = vector.broadcast %96 : vector<8x1xf32> to vector<8x8xf32>
    %98 = arith.mulf %93, %97 : vector<8x8xf32>
    %99 = arith.truncf %98 : vector<8x8xf32> to vector<8x8xbf16>
    %100 = vector.extract_strided_slice %42 {offsets = [0, 16], sizes = [8, 8], strides = [1, 1]} : vector<8x32xbf16> to vector<8x8xbf16>
    %cst_42 = arith.constant dense<0.000000e+00> : vector<8x8xf32>
    %101 = tpu.matmul %99, %100, %cst_42 {dimension_numbers = #tpu.dot_dimension_numbers<[1], [0], [0], [1], [0, 0, 1, 1], [], []>} : vector<8x8xbf16>, vector<8x8xbf16>, vector<8x8xf32> -> vector<8x8xf32>
    %102 = arith.truncf %101 : vector<8x8xf32> to vector<8x8xbf16>
    %c2 = arith.constant 2 : index
    %c0_43 = arith.constant 0 : index
    %c0_44 = arith.constant 0 : index
    %103 = vector.load %arg9[%c2, %c0_43, %c0_44] : memref<4x8x32xbf16, #tpu.memory_space<vmem>>, vector<1x8x32xbf16>
    %104 = vector.shape_cast %103 : vector<1x8x32xbf16> to vector<8x32xbf16>
    %cst_45 = arith.constant dense<0.000000e+00> : vector<8x32xf32>
    %105 = tpu.matmul %102, %104, %cst_45 {dimension_numbers = #tpu.dot_dimension_numbers<[1], [0], [0], [1], [0, 0, 1, 1], [], []>} : vector<8x8xbf16>, vector<8x32xbf16>, vector<8x32xf32> -> vector<8x32xf32>
    %106 = arith.addf %85, %105 : vector<8x32xf32>
    %107 = vector.extract_strided_slice %40 {offsets = [0, 24], sizes = [8, 8], strides = [1, 1]} : vector<8x32xbf16> to vector<8x8xbf16>
    %108 = vector.extract_strided_slice %41 {offsets = [0, 24], sizes = [8, 8], strides = [1, 1]} : vector<8x32xbf16> to vector<8x8xbf16>
    %cst_46 = arith.constant dense<0.000000e+00> : vector<8x8xf32>
    %109 = tpu.matmul %107, %108, %cst_46 {dimension_numbers = #tpu.dot_dimension_numbers<[1], [1], [0], [0], [0, 0, 1, 0], [], []>} : vector<8x8xbf16>, vector<8x8xbf16>, vector<8x8xf32> -> vector<8x8xf32>
    %cst_47 = arith.constant dense<0xFF800000> : vector<8xf32>
    %110 = vector.multi_reduction <maximumf>, %109, %cst_47 [1] : vector<8x8xf32> to vector<8xf32>
    %111 = vector.shape_cast %110 : vector<8xf32> to vector<8x1xf32>
    %112 = vector.broadcast %111 : vector<8x1xf32> to vector<8x8xf32>
    %113 = arith.subf %109, %112 : vector<8x8xf32>
    %114 = math.exp %113 : vector<8x8xf32>
    %cst_48 = arith.constant dense<0.000000e+00> : vector<8xf32>
    %115 = vector.multi_reduction <add>, %114, %cst_48 [1] : vector<8x8xf32> to vector<8xf32>
    %116 = vector.shape_cast %115 : vector<8xf32> to vector<8x1xf32>
    %117 = tpu.reciprocal %116 {approx = true} : vector<8x1xf32> -> vector<8x1xf32>
    %118 = vector.broadcast %117 : vector<8x1xf32> to vector<8x8xf32>
    %119 = arith.mulf %114, %118 : vector<8x8xf32>
    %120 = arith.truncf %119 : vector<8x8xf32> to vector<8x8xbf16>
    %121 = vector.extract_strided_slice %42 {offsets = [0, 24], sizes = [8, 8], strides = [1, 1]} : vector<8x32xbf16> to vector<8x8xbf16>
    %cst_49 = arith.constant dense<0.000000e+00> : vector<8x8xf32>
    %122 = tpu.matmul %120, %121, %cst_49 {dimension_numbers = #tpu.dot_dimension_numbers<[1], [0], [0], [1], [0, 0, 1, 1], [], []>} : vector<8x8xbf16>, vector<8x8xbf16>, vector<8x8xf32> -> vector<8x8xf32>
    %123 = arith.truncf %122 : vector<8x8xf32> to vector<8x8xbf16>
    %c3 = arith.constant 3 : index
    %c0_50 = arith.constant 0 : index
    %c0_51 = arith.constant 0 : index
    %124 = vector.load %arg9[%c3, %c0_50, %c0_51] : memref<4x8x32xbf16, #tpu.memory_space<vmem>>, vector<1x8x32xbf16>
    %125 = vector.shape_cast %124 : vector<1x8x32xbf16> to vector<8x32xbf16>
    %cst_52 = arith.constant dense<0.000000e+00> : vector<8x32xf32>
    %126 = tpu.matmul %123, %125, %cst_52 {dimension_numbers = #tpu.dot_dimension_numbers<[1], [0], [0], [1], [0, 0, 1, 1], [], []>} : vector<8x8xbf16>, vector<8x32xbf16>, vector<8x32xf32> -> vector<8x32xf32>
    %127 = arith.addf %106, %126 : vector<8x32xf32>
    %c0_53 = arith.constant 0 : index
    %c0_54 = arith.constant 0 : index
    %128 = vector.load %arg10[%c0_53, %c0_54] : memref<1x32xf32, #tpu.memory_space<vmem>>, vector<1x32xf32>
    %129 = vector.broadcast %128 : vector<1x32xf32> to vector<8x32xf32>
    %130 = arith.addf %127, %129 : vector<8x32xf32>
    %131 = arith.addf %23, %130 : vector<8x32xf32>
    %c0_55 = arith.constant 0 : index
    %c0_56 = arith.constant 0 : index
    %132 = vector.load %arg11[%c0_55, %c0_56] : memref<1x32xf32, #tpu.memory_space<vmem>>, vector<1x32xf32>
    %c0_57 = arith.constant 0 : index
    %c0_58 = arith.constant 0 : index
    %133 = vector.load %arg12[%c0_57, %c0_58] : memref<1x32xf32, #tpu.memory_space<vmem>>, vector<1x32xf32>
    %cst_59 = arith.constant dense<0.000000e+00> : vector<8xf32>
    %134 = vector.multi_reduction <add>, %131, %cst_59 [1] : vector<8x32xf32> to vector<8xf32>
    %135 = vector.shape_cast %134 : vector<8xf32> to vector<8x1xf32>
    %cst_60 = arith.constant 3.200000e+01 : f32
    %136 = vector.broadcast %cst_60 : f32 to vector<8x1xf32>
    %137 = arith.divf %135, %136 : vector<8x1xf32>
    %138 = vector.broadcast %137 : vector<8x1xf32> to vector<8x32xf32>
    %139 = arith.subf %131, %138 : vector<8x32xf32>
    %140 = arith.mulf %139, %139 : vector<8x32xf32>
    %cst_61 = arith.constant dense<0.000000e+00> : vector<8xf32>
    %141 = vector.multi_reduction <add>, %140, %cst_61 [1] : vector<8x32xf32> to vector<8xf32>
    %142 = vector.shape_cast %141 : vector<8xf32> to vector<8x1xf32>
    %cst_62 = arith.constant 3.200000e+01 : f32
    %143 = vector.broadcast %cst_62 : f32 to vector<8x1xf32>
    %144 = arith.divf %142, %143 : vector<8x1xf32>
    %cst_63 = arith.constant 9.99999974E-6 : f32
    %145 = vector.broadcast %cst_63 : f32 to vector<8x1xf32>
    %146 = arith.addf %144, %145 : vector<8x1xf32>
    %147 = math.rsqrt %146 : vector<8x1xf32>
    %148 = vector.broadcast %147 : vector<8x1xf32> to vector<8x32xf32>
    %149 = arith.mulf %139, %148 : vector<8x32xf32>
    %150 = vector.broadcast %132 : vector<1x32xf32> to vector<8x32xf32>
    %151 = arith.mulf %149, %150 : vector<8x32xf32>
    %152 = vector.broadcast %133 : vector<1x32xf32> to vector<8x32xf32>
    %153 = arith.addf %151, %152 : vector<8x32xf32>
    %154 = arith.truncf %153 : vector<8x32xf32> to vector<8x32xbf16>
    %c0_64 = arith.constant 0 : index
    %c0_65 = arith.constant 0 : index
    %155 = vector.load %arg13[%c0_64, %c0_65] : memref<32x128xbf16, #tpu.memory_space<vmem>>, vector<32x128xbf16>
    %cst_66 = arith.constant dense<0.000000e+00> : vector<8x128xf32>
    %156 = tpu.matmul %154, %155, %cst_66 {dimension_numbers = #tpu.dot_dimension_numbers<[1], [0], [0], [1], [0, 0, 1, 1], [], []>} : vector<8x32xbf16>, vector<32x128xbf16>, vector<8x128xf32> -> vector<8x128xf32>
    %c0_67 = arith.constant 0 : index
    %c0_68 = arith.constant 0 : index
    %157 = vector.load %arg14[%c0_67, %c0_68] : memref<1x128xf32, #tpu.memory_space<vmem>>, vector<1x128xf32>
    %158 = vector.broadcast %157 : vector<1x128xf32> to vector<8x128xf32>
    %159 = arith.addf %156, %158 : vector<8x128xf32>
    %cst_69 = arith.constant 0.000000e+00 : f32
    %160 = vector.broadcast %cst_69 : f32 to vector<8x128xf32>
    %161 = arith.maximumf %159, %160 : vector<8x128xf32>
    %162 = arith.truncf %161 : vector<8x128xf32> to vector<8x128xbf16>
    %c0_70 = arith.constant 0 : index
    %c0_71 = arith.constant 0 : index
    %163 = vector.load %arg15[%c0_70, %c0_71] : memref<128x32xbf16, #tpu.memory_space<vmem>>, vector<128x32xbf16>
    %cst_72 = arith.constant dense<0.000000e+00> : vector<8x32xf32>
    %164 = tpu.matmul %162, %163, %cst_72 {dimension_numbers = #tpu.dot_dimension_numbers<[1], [0], [0], [1], [0, 0, 1, 1], [], []>} : vector<8x128xbf16>, vector<128x32xbf16>, vector<8x32xf32> -> vector<8x32xf32>
    %c0_73 = arith.constant 0 : index
    %c0_74 = arith.constant 0 : index
    %165 = vector.load %arg16[%c0_73, %c0_74] : memref<1x32xf32, #tpu.memory_space<vmem>>, vector<1x32xf32>
    %166 = vector.broadcast %165 : vector<1x32xf32> to vector<8x32xf32>
    %167 = arith.addf %164, %166 : vector<8x32xf32>
    %168 = arith.addf %131, %167 : vector<8x32xf32>
    %c0_75 = arith.constant 0 : index
    %c0_76 = arith.constant 0 : index
    %c0_77 = arith.constant 0 : index
    %169 = vector.load %arg17[%c0_75, %c0_76, %c0_77] : memref<1x8x32xf32, #tpu.memory_space<vmem>>, vector<1x8x32xf32>
    %170 = vector.shape_cast %169 : vector<1x8x32xf32> to vector<8x32xf32>
    %171 = vector.shape_cast %168 : vector<8x32xf32> to vector<1x8x32xf32>
    tpu.vector_store %arg17[%c0_75, %c0_76, %c0_77], %171 {strides = array<i32>} : memref<1x8x32xf32, #tpu.memory_space<vmem>>, vector<1x8x32xf32>,
    return
  }
  func.func @transform_0(%arg0: i32) -> (i32, i32, i32) {
    %c0_i32 = arith.constant 0 : i32
    %c0_i32_0 = arith.constant 0 : i32
    %c0_i32_1 = arith.constant 0 : i32
    return %arg0, %c0_i32, %c0_i32_0 : i32, i32, i32
  }
  func.func @transform_1(%arg0: i32) -> (i32, i32, i32) {
    %c0_i32 = arith.constant 0 : i32
    %c0_i32_0 = arith.constant 0 : i32
    %c0_i32_1 = arith.constant 0 : i32
    return %arg0, %c0_i32, %c0_i32_0 : i32, i32, i32
  }
  func.func @transform_2(%arg0: i32) -> (i32, i32) {
    %c0_i32 = arith.constant 0 : i32
    %c0_i32_0 = arith.constant 0 : i32
    %c0_i32_1 = arith.constant 0 : i32
    return %c0_i32, %c0_i32_0 : i32, i32
  }
  func.func @transform_3(%arg0: i32) -> (i32, i32) {
    %c0_i32 = arith.constant 0 : i32
    %c0_i32_0 = arith.constant 0 : i32
    %c0_i32_1 = arith.constant 0 : i32
    return %c0_i32, %c0_i32_0 : i32, i32
  }
  func.func @transform_4(%arg0: i32) -> (i32, i32) {
    %c0_i32 = arith.constant 0 : i32
    %c0_i32_0 = arith.constant 0 : i32
    %c0_i32_1 = arith.constant 0 : i32
    return %c0_i32, %c0_i32_0 : i32, i32
  }
  func.func @transform_5(%arg0: i32) -> (i32, i32) {
    %c0_i32 = arith.constant 0 : i32
    %c0_i32_0 = arith.constant 0 : i32
    %c0_i32_1 = arith.constant 0 : i32
    return %c0_i32, %c0_i32_0 : i32, i32
  }
  func.func @transform_6(%arg0: i32) -> (i32, i32) {
    %c0_i32 = arith.constant 0 : i32
    %c0_i32_0 = arith.constant 0 : i32
    %c0_i32_1 = arith.constant 0 : i32
    return %c0_i32, %c0_i32_0 : i32, i32
  }
  func.func @transform_7(%arg0: i32) -> (i32, i32) {
    %c0_i32 = arith.constant 0 : i32
    %c0_i32_0 = arith.constant 0 : i32
    %c0_i32_1 = arith.constant 0 : i32
    return %c0_i32, %c0_i32_0 : i32, i32
  }
  func.func @transform_8(%arg0: i32) -> (i32, i32, i32) {
    %c0_i32 = arith.constant 0 : i32
    %c0_i32_0 = arith.constant 0 : i32
    %c0_i32_1 = arith.constant 0 : i32
    %c0_i32_2 = arith.constant 0 : i32
    return %c0_i32, %c0_i32_0, %c0_i32_1 : i32, i32, i32
  }
  func.func @transform_9(%arg0: i32) -> (i32, i32) {
    %c0_i32 = arith.constant 0 : i32
    %c0_i32_0 = arith.constant 0 : i32
    %c0_i32_1 = arith.constant 0 : i32
    return %c0_i32, %c0_i32_0 : i32, i32
  }
  func.func @transform_10(%arg0: i32) -> (i32, i32) {
    %c0_i32 = arith.constant 0 : i32
    %c0_i32_0 = arith.constant 0 : i32
    %c0_i32_1 = arith.constant 0 : i32
    return %c0_i32, %c0_i32_0 : i32, i32
  }
  func.func @transform_11(%arg0: i32) -> (i32, i32) {
    %c0_i32 = arith.constant 0 : i32
    %c0_i32_0 = arith.constant 0 : i32
    %c0_i32_1 = arith.constant 0 : i32
    return %c0_i32, %c0_i32_0 : i32, i32
  }
  func.func @transform_12(%arg0: i32) -> (i32, i32) {
    %c0_i32 = arith.constant 0 : i32
    %c0_i32_0 = arith.constant 0 : i32
    %c0_i32_1 = arith.constant 0 : i32
    return %c0_i32, %c0_i32_0 : i32, i32
  }
  func.func @transform_13(%arg0: i32) -> (i32, i32) {
    %c0_i32 = arith.constant 0 : i32
    %c0_i32_0 = arith.constant 0 : i32
    %c0_i32_1 = arith.constant 0 : i32
    return %c0_i32, %c0_i32_0 : i32, i32
  }
  func.func @transform_14(%arg0: i32) -> (i32, i32) {
    %c0_i32 = arith.constant 0 : i32
    %c0_i32_0 = arith.constant 0 : i32
    %c0_i32_1 = arith.constant 0 : i32
    return %c0_i32, %c0_i32_0 : i32, i32
  }
  func.func @transform_15(%arg0: i32) -> (i32, i32) {
    %c0_i32 = arith.constant 0 : i32
    %c0_i32_0 = arith.constant 0 : i32
    %c0_i32_1 = arith.constant 0 : i32
    return %c0_i32, %c0_i32_0 : i32, i32
  }
  func.func @transform_16(%arg0: i32) -> (i32, i32, i32) {
    %c0_i32 = arith.constant 0 : i32
    %c0_i32_0 = arith.constant 0 : i32
    %c0_i32_1 = arith.constant 0 : i32
    return %arg0, %c0_i32, %c0_i32_0 : i32, i32, i32
  }
}

</mosaic_0001>

<bundles_post_ra>
// kernel: forward.3
= control target key start
LH: loop header
LB: loop body
LE: loop exit
PB: predicated region body
PF: predicated region fallthrough
CT: control target
= control target key end

     0   :  { %s1988_s21 = smov 0   ;;  %s2222_s0 = inlined_call_operand.vmem [shape: f32[2,8,32], index: 0, kind: input, shape index: {}]   ;;  %s2223_s1 = inlined_call_operand.vmem [shape: f32[2,8,32], index: 1, kind: input, shape index: {}]   ;;  %s2224_s2 = inlined_call_operand.vmem [shape: f32[1,32], index: 2, kind: input, shape index: {}]   ;;  %s2225_s3 = inlined_call_operand.vmem [shape: f32[1,32], index: 3, kind: input, shape index: {}]   ;;  %s2226_s4 = inlined_call_operand.vmem [shape: bf16[32,32], index: 4, kind: input, shape index: {}]   ;;  %s2227_s5 = inlined_call_operand.vmem [shape: f32[1,32], index: 5, kind: input, shape index: {}]   ;;  %s2228_s6 = inlined_call_operand.vmem [shape: bf16[32,64], index: 6, kind: input, shape index: {}]   ;;  %s2229_s7 = inlined_call_operand.vmem [shape: f32[1,64], index: 7, kind: input, shape index: {}]   ;;  %s2230_s8 = inlined_call_operand.vmem [shape: bf16[4,8,32], index: 8, kind: input, shape index: {}]   ;;  %s2231_s9 = inlined_call_operand.vmem [shape: f32[1,32], index: 9, kind: input, shape index: {}]   ;;  %s2232_s10 = inlined_call_operand.vmem [shape: f32[1,32], index: 10, kind: input, shape index: {}]   ;;  %s2233_s11 = inlined_call_operand.vmem [shape: f32[1,32], index: 11, kind: input, shape index: {}]   ;;  %s2234_s12 = inlined_call_operand.vmem [shape: bf16[32,128], index: 12, kind: input, shape index: {}]   ;;  %s2235_s13 = inlined_call_operand.vmem [shape: f32[1,128], index: 13, kind: input, shape index: {}]   ;;  %s2236_s14 = inlined_call_operand.vmem [shape: bf16[128,32], index: 14, kind: input, shape index: {}]   ;;  %s2237_s15 = inlined_call_operand.vmem [shape: f32[1,32], index: 15, kind: input, shape index: {}]   ;;  %s2238_s16 = inlined_call_operand.vmem [shape: f32[2,8,32], index: 16, kind: output, shape index: {}]  }
   0x1   :  { %2239 = sst [smem:[#allocation2_spill]] %s2222_s0 }
   0x2 LB: > { %s1626_s22 = sadd.s32 4294967295, %s1892_s21   ;;  %p1630_p0 = scmp.ge.s32.totalorder %s1892_s21, 1  ;;  %s1892_s21 = sphi %s1988_s21, %s26_s21  }
   0x3   : > { %p470_p1 = scmp.lt.s32.totalorder %s1892_s21, 3 }
   0x5   : > { %p471_p2 = pnand %p1630_p0, %p470_p1 }
   0x6   : > { %v1852_v0 = vld [vmem:[%s2226_s4] sm:$0xff] (!%p471_p2)   ;;  %v1894_v1 = vmov (!%p471_p2), 0.0   ;;  %v1853_v2 = vld [vmem:[%s2226_s4 + $0x8] sm:$0xff] (!%p471_p2)   ;;  %vm1895_vm0 = vmmov (!%p471_p2), 0   ;;  %p522_p3 = scmp.lt.s32.totalorder (!%p471_p2), %s1626_s22, 1  ;;  %s2240_s30 = sld [smem:[#allocation2_spill]] (!%p471_p2) }
   0x7   : > { %474 = sbr.rel (%p471_p2) target bundleno = 3363 (0xd23), region = 84  ;;  %1719 = vmatprep.subr.bf16.mxu0 (!%p471_p2), %v1894_v1  ;;  %1741 = vmatprep.subr.bf16.mxu1 (!%p471_p2), %v1894_v1  ;;  %vm538_vm1 = vcmask (!%p471_p2), 261120   ;;  %v1854_v4 = vld [vmem:[%s2228_s6] sm:$0xff] (!%p471_p2)   ;;  %v1855_v6 = vld [vmem:[%s2228_s6 + $0x8] sm:$0xff] (!%p471_p2)   ;;  %vm704_vm2 = vcmask (!%p471_p2), 64512   ;;  %vm769_vm3 = vcmask (!%p471_p2), 1043456  }
   0x8   : > { %1720 = vmatpush3.bf16.msra.mxu0 (!%p471_p2), %v1852_v0  ;;  %1723 = vmatprep.mubr.msk.bf16.mxu0 (!%p471_p2), %vm1895_vm0, %v1894_v1  ;;  %v1640_v13 = vld [vmem:[%s2229_s7] ss:$0 sm:$0xff] (!%p471_p2)  ;;  %s1898_s17 = smov (!%p471_p2), 88   ;;  %s1899_s18 = smov (!%p471_p2), 112   ;;  %v1648_v53 = vld [vmem:[%s2230_s8 + $0x4] sm:$0xf] (!%p471_p2) }
   0x9   : > { %1721 = vmatprep.subr.bf16.mxu0 (!%p471_p2), %v1894_v1  ;;  %1743 = vmatprep.mubr.msk.bf16.mxu1 (!%p471_p2), %vm1895_vm0, %v1894_v1  ;;  %v1636_v14 = vld [vmem:[%s2227_s5] ss:$0 sm:$0xff] (!%p471_p2)  ;;  %v933_v54 = vsel (!%p471_p2), %vm769_vm3, %v1648_v53, 0  ;;  %s1900_s24 = smov (!%p471_p2), 80   ;;  %s1901_s25 = smov (!%p471_p2), 104  }
   0xa   : > { %v814_v59 = vld [vmem:[%s2230_s8] sm:$0xf] (!%p471_p2)  ;;  %s1902_s29 = smov (!%p471_p2), 72  }
   0xb   : > { %v979_v62 = vsel (!%p471_p2), %vm769_vm3, %v814_v59, 0 }
   0xc   : > { %1722 = vmatpush3.bf16.msra.mxu0 (!%p471_p2), %v1853_v2 }
   0xd   : > { %1727 = vmatprep.subr.bf16.mxu0 (!%p471_p2), %v1894_v1 }
   0xe   : > { %s2242_s22 = smov (!%p522_p3, %s1626_s22), 1 }
   0xf   : > { %s2009_s27 = sshll.u32 %s2242_s22, 3 }
  0x10   : > { %s525_s0 = scalar_lea.vmem %s2240_s30, %s2009_s27  ;;  %s529_s22 = scalar_lea.vmem %s2223_s1, %s2009_s27 }
  0x11   : > { %v2016_v3 = vld [vmem:[%s525_s0] sm:$0xff]  ;;  %s1896_s30 = smov 120   ;;  %s1897_s0 = smov 96  }
  0x12   : > { %v567_v5 = vpack.c.bf16 %v2016_v3, %v2016_v3  ;;  %v634_v7 = vld [vmem:[%s529_s22] sm:$0xff] }
  0x13   : > { %v635_v8 = vpack.c.bf16 %v634_v7, %v634_v7 }
  0x14   : > { %1724 = vmatmul.mubr.msk.bf16.vlgmr.msra.gmra.mrb[0].mxu0 %vm538_vm1, %v567_v5 }
  0x15   : > { %1728 = vmatpush3.bf16.msra.mxu0 %v1854_v4  ;;  %1731 = vmatprep.mubr.msk.bf16.mxu0 %vm1895_vm0, %v1894_v1 }
  0x16   : > { %1729 = vmatprep.subr.bf16.mxu0 %v1894_v1 }
  0x19   : > { %1730 = vmatpush3.bf16.msra.mxu0 %v1855_v6 }
  0x1a   : > { %1735 = vmatprep.subr.bf16.mxu0 %v1894_v1 }
  0x1c   : > { %1732 = vmatmul.mubr.msk.bf16.vlgmr.msra.gmra.mrb[4].mxu0 %vm538_vm1, %v635_v8 }
  0x1d   : > { %1737 = vmatprep.mubr.msk.bf16.mxu0 %vm1895_vm0, %v1894_v1 }
  0xe7   : > { %v628_v9 = vpop.f32.mrb[0].mxu0 }
  0xe8   : > { %v1725_v10 = vpop.f32.mrb[1].mxu0  ;;  %v629_v19 = vadd.f32 %v1636_v14, %v628_v9 }
  0xe9   : > { %v631_v11 = vpop.f32.mrb[2].mxu0 }
  0xea   : > { %v1726_v12 = vpop.f32.mrb[3].mxu0  ;;  %v2049_v23 = vpack.c.bf16 %v629_v19, %v629_v19 }
  0xef   : > { %v696_v15 = vpop.f32.mrb[4].mxu0 }
  0xf0   : > { %v697_v16 = vadd.f32 %v1640_v13, %v696_v15  ;;  %v1733_v17 = vpop.f32.mrb[5].mxu0 }
  0xf1   : > { %v699_v18 = vpop.f32.mrb[6].mxu0 }
  0xf2   : > { %v2044_v20 = vpack.c.bf16 %v697_v16, %v697_v16  ;;  %v1734_v21 = vpop.f32.mrb[7].mxu0 }
  0xf4   : > { %818 = vrot.lane.b32.xlu0 %v2044_v20, %s1896_s30  ;;  %v709_v22 = vsel %vm704_vm2, %v2044_v20, 0 }
  0xf5   : > { %1736 = vmatpush3.bf16.xpose.msra.mxu0 %v709_v22 }
  0xf6   : > { %1747 = vmatprep.subr.bf16.mxu0 %v1894_v1 }
  0xf8   : > { %816 = vrot.lane.b32.xlu0 %v2049_v23, %s1896_s30 }
  0xfc   : > { %1738 = vmatmul.mubr.msk.bf16.vlgmr.msra.gmra.mrb[8].mxu0 %vm704_vm2, %v2049_v23 }
  0xfd   : > { %1749 = vmatprep.mubr.msk.bf16.mxu0 %vm1895_vm0, %v1894_v1 }
 0x166   : > { %v819_v24 = vpop.permute.xlu0 %818 }
 0x167   : > { %v824_v25 = vsel %vm704_vm2, %v819_v24, 0 }
 0x168   : > { %1748 = vmatpush3.bf16.xpose.msra.mxu0 %v824_v25 }
 0x169   : > { %1759 = vmatprep.subr.bf16.mxu0 %v1894_v1 }
 0x16a   : > { %v817_v26 = vpop.permute.xlu0 %816 }
 0x16f   : > { %1750 = vmatmul.mubr.msk.bf16.vlgmr.msra.gmra.mrb[12].mxu0 %vm704_vm2, %v817_v26 }
 0x170   : > { %1761 = vmatprep.mubr.msk.bf16.mxu0 %vm1895_vm0, %v1894_v1  ;;  %1760 = vmatpush3.bf16.msra.mxu0 %v933_v54 }
 0x171   : > { %1771 = vmatprep.subr.bf16.mxu0 %v1894_v1 }
 0x1cf   : > { %v745_v27 = vpop.f32.mrb[8].mxu0 }
 0x1d0   : > { %v1739_v28 = vpop.f32.mrb[9].mxu0  ;;  %v751_v29 = vsel %vm704_vm2, %v745_v27, -inf }
 0x1d1   : > { %752 = vmax.xlane.f32.xlu1 %v751_v29  ;;  %v748_v30 = vpop.f32.mrb[10].mxu0 }
 0x1d2   : > { %v1740_v31 = vpop.f32.mrb[11].mxu0 }
 0x242   : > { %v860_v32 = vpop.f32.mrb[12].mxu0 }
 0x243   : > { %v1751_v33 = vpop.f32.mrb[13].mxu0  ;;  %v866_v34 = vsel %vm704_vm2, %v860_v32, -inf }
 0x244   : > { %867 = vmax.xlane.f32.xlu1 %v866_v34  ;;  %v863_v35 = vpop.f32.mrb[14].mxu0 }
 0x245   : > { %v1752_v36 = vpop.f32.mrb[15].mxu0 }
 0x255   : > { %764 = vrot.lane.b32.xlu1 %v2044_v20, %s1897_s0 }
 0x25e   : > { %v753_v37 = vpop.xlane.xlu1 %752 }
 0x25f   : > { %v754_v38 = vsub.f32 %v745_v27, %v753_v37 }
 0x261   : > { %v755_v39 = vmul.f32 1.442695, %v754_v38 }
 0x263   : > { %1866 = vpow2.f32 %v755_v39 }
 0x26d   : > { %v1867_v40 = vpop.eup %1866 }
 0x26e   : > { %v757_v41 = vsel %vm704_vm2, %v1867_v40, 0.0 }
 0x26f   : > { %758 = vadd.xlane.f32.xlu0 %v757_v41 }
 0x2d1   : > { %v868_v42 = vpop.xlane.xlu1 %867 }
 0x2d2   : > { %v869_v43 = vsub.f32 %v860_v32, %v868_v42 }
 0x2d4   : > { %v870_v44 = vmul.f32 1.442695, %v869_v43  ;;  %v1653_v43 = vld [vmem:[%s2230_s8 + $0x8] sm:$0xf] }
 0x2d5   : > { %v765_v45 = vpop.permute.xlu1 %764 }
 0x2d6   : > { %1868 = vpow2.f32 %v870_v44  ;;  %v771_v46 = vsel %vm769_vm3, %v765_v45, 0  ;;  %v1138_v44 = vsel %vm769_vm3, %v1653_v43, 0 }
 0x2d7   : > { %1742 = vmatpush3.bf16.msra.mxu1 %v771_v46 }
 0x2d8   : > { %1753 = vmatprep.subr.bf16.mxu1 %v1894_v1 }
 0x2e0   : > { %v1869_v47 = vpop.eup %1868 }
 0x2e1   : > { %v872_v48 = vsel %vm704_vm2, %v1869_v47, 0.0 }
 0x2e2   : > { %873 = vadd.xlane.f32.xlu1 %v872_v48 }
 0x2f3   : > { %878 = vrot.lane.b32.xlu1 %v2044_v20, %s1898_s17 }
 0x2f7   : > { %1023 = vrot.lane.b32.xlu1 %v2044_v20, %s1899_s18 }
 0x2fb   : > { %1021 = vrot.lane.b32.xlu1 %v2049_v23, %s1899_s18 }
 0x2fc   : > { %v759_v49 = vpop.xlane.xlu0 %758 }
 0x2fd   : > { %1870 = vrcp.f32 %v759_v49 }
 0x307   : > { %v1871_v50 = vpop.eup %1870 }
 0x308   : > { %v761_v51 = vmul.f32 %v1871_v50, %v1867_v40 }
 0x30a   : > { %v762_v52 = vpack.c.bf16 %v761_v51, %v761_v51 }
 0x30c   : > { %1744 = vmatmul.mubr.msk.bf16.vlgmr.msra.gmra.mrb[0].mxu1 %vm704_vm2, %v762_v52 }
 0x30d   : > { %1755 = vmatprep.mubr.msk.bf16.mxu1 %vm1895_vm0, %v1894_v1 }
 0x36f   : > { %v874_v55 = vpop.xlane.xlu1 %873 }
 0x370   : > { %1872 = vrcp.f32 %v874_v55 }
 0x373   : > { %v879_v56 = vpop.permute.xlu1 %878 }
 0x374   : > { %v884_v57 = vsel %vm769_vm3, %v879_v56, 0 }
 0x375   : > { %1754 = vmatpush3.bf16.msra.mxu1 %v884_v57 }
 0x376   : > { %1765 = vmatprep.subr.bf16.mxu1 %v1894_v1 }
 0x377   : > { %v1024_v6 = vpop.permute.xlu1 %1023 }
 0x378   : > { %v1029_v11 = vsel %vm704_vm2, %v1024_v6, 0 }
 0x37a   : > { %v1873_v58 = vpop.eup %1872 }
 0x37b   : > { %v876_v60 = vmul.f32 %v1873_v58, %v1869_v47  ;;  %v1022_v13 = vpop.permute.xlu1 %1021 }
 0x37d   : > { %v877_v61 = vpack.c.bf16 %v876_v60, %v876_v60 }
 0x37f   : > { %1756 = vmatmul.mubr.msk.bf16.vlgmr.msra.gmra.mrb[4].mxu1 %vm704_vm2, %v877_v61 }
 0x380   : > { %1766 = vmatpush3.bf16.msra.mxu1 %v979_v62  ;;  %1767 = vmatprep.mubr.msk.bf16.mxu1 %vm1895_vm0, %v1894_v1 }
 0x381   : > { %1777 = vmatprep.subr.bf16.mxu1 %v1894_v1 }
 0x3df   : > { %v807_v63 = vpop.f32.mrb[0].mxu1 }
 0x3e0   : > { %v813_v0 = vpack.c.bf16 %v807_v63, %v807_v63  ;;  %v1745_v2 = vpop.f32.mrb[1].mxu1 }
 0x3e1   : > { %v810_v4 = vpop.f32.mrb[2].mxu1  ;;  %v539_v2 = vsel %vm538_vm1, %v2016_v3, 0.0 }
 0x3e2   : > { %v1746_v5 = vpop.f32.mrb[3].mxu1  ;;  %1768 = vmatmul.mubr.msk.bf16.vlgmr.msra.gmra.mrb[8].mxu1 %vm704_vm2, %v813_v0  ;;  %v1657_v4 = vld [vmem:[%s2230_s8 + $0xc] sm:$0xf] }
 0x3e3   : > { %1779 = vmatprep.mubr.msk.bf16.mxu1 %vm1895_vm0, %v1894_v1  ;;  %v1298_v5 = vsel %vm769_vm3, %v1657_v4, 0 }
 0x452   : > { %v920_v7 = vpop.f32.mrb[4].mxu1 }
 0x453   : > { %v926_v8 = vpack.c.bf16 %v920_v7, %v920_v7  ;;  %v1757_v9 = vpop.f32.mrb[5].mxu1 }
 0x454   : > { %v923_v10 = vpop.f32.mrb[6].mxu1 }
 0x455   : > { %v1758_v12 = vpop.f32.mrb[7].mxu1  ;;  %1762 = vmatmul.mubr.msk.bf16.vlgmr.msra.gmra.mrb[16].mxu0 %vm704_vm2, %v926_v8 }
 0x456   : > { %1772 = vmatpush3.bf16.xpose.msra.mxu0 %v1029_v11  ;;  %1773 = vmatprep.mubr.msk.bf16.mxu0 %vm1895_vm0, %v1894_v1 }
 0x457   : > { %1783 = vmatprep.subr.bf16.mxu0 %v1894_v1 }
 0x45d   : > { %1774 = vmatmul.mubr.msk.bf16.vlgmr.msra.gmra.mrb[20].mxu0 %vm704_vm2, %v1022_v13 }
 0x45e   : > { %1785 = vmatprep.mubr.msk.bf16.mxu0 %vm1895_vm0, %v1894_v1  ;;  %1784 = vmatpush3.bf16.msra.mxu0 %v1138_v44  ;;  %v1856_v44 = vld [vmem:[%s2234_s12] sm:$0xff]  }
 0x45f   : > { %1795 = vmatprep.subr.bf16.mxu0 %v1894_v1 }
 0x4b5   : > { %v1015_v14 = vpop.f32.mrb[8].mxu1 }
 0x4b6   : > { %v1769_v15 = vpop.f32.mrb[9].mxu1 }
 0x4b7   : > { %v1018_v16 = vpop.f32.mrb[10].mxu1 }
 0x4b8   : > { %v1770_v17 = vpop.f32.mrb[11].mxu1 }
 0x528   : > { %v969_v18 = vpop.f32.mrb[16].mxu0 }
 0x529   : > { %v2101_v19 = vadd.f32 %v1015_v14, %v969_v18  ;;  %v1763_v21 = vpop.f32.mrb[17].mxu0 }
 0x52a   : > { %v972_v22 = vpop.f32.mrb[18].mxu0 }
 0x52b   : > { %v1764_v24 = vpop.f32.mrb[19].mxu0 }
 0x530   : > { %v1065_v25 = vpop.f32.mrb[20].mxu0 }
 0x531   : > { %v1775_v26 = vpop.f32.mrb[21].mxu0  ;;  %v1071_v27 = vsel %vm704_vm2, %v1065_v25, -inf }
 0x532   : > { %1072 = vmax.xlane.f32.xlu0 %v1071_v27  ;;  %v1068_v28 = vpop.f32.mrb[22].mxu0  ;;  %v1634_v27 = vld [vmem:[%s2224_s2] ss:$0 sm:$0xff] }
 0x533   : > { %v1776_v29 = vpop.f32.mrb[23].mxu0 }
 0x534   : > { %v1635_v29 = vld [vmem:[%s2225_s3] ss:$0 sm:$0xff] }
 0x548   : > { %1083 = vrot.lane.b32.xlu0 %v2044_v20, %s1900_s24 }
 0x54c   : > { %1183 = vrot.lane.b32.xlu0 %v2044_v20, %s1901_s25 }
 0x550   : > { %1181 = vrot.lane.b32.xlu0 %v2049_v23, %s1901_s25 }
 0x5bf   : > { %v1073_v30 = vpop.xlane.xlu0 %1072 }
 0x5c0   : > { %v1074_v31 = vsub.f32 %v1065_v25, %v1073_v30 }
 0x5c2   : > { %v1075_v32 = vmul.f32 1.442695, %v1074_v31  ;;  %v1659_v31 = vld [vmem:[%s2231_s9] ss:$0 sm:$0xff] }
 0x5c3   : > { %v1084_v33 = vpop.permute.xlu0 %1083 }
 0x5c4   : > { %1874 = vpow2.f32 %v1075_v32  ;;  %v1089_v34 = vsel %vm769_vm3, %v1084_v33, 0 }
 0x5c5   : > { %1778 = vmatpush3.bf16.msra.mxu1 %v1089_v34 }
 0x5c6   : > { %1789 = vmatprep.subr.bf16.mxu1 %v1894_v1 }
 0x5c7   : > { %v1184_v40 = vpop.permute.xlu0 %1183 }
 0x5c8   : > { %v1189_v41 = vsel %vm704_vm2, %v1184_v40, 0 }
 0x5cb   : > { %v1182_v42 = vpop.permute.xlu0 %1181 }
 0x5ce   : > { %v1875_v35 = vpop.eup %1874 }
 0x5cf   : > { %v1077_v36 = vsel %vm704_vm2, %v1875_v35, 0.0 }
 0x5d0   : > { %1078 = vadd.xlane.f32.xlu1 %v1077_v36 }
 0x65d   : > { %v1079_v37 = vpop.xlane.xlu1 %1078 }
 0x65e   : > { %1876 = vrcp.f32 %v1079_v37 }
 0x668   : > { %v1877_v38 = vpop.eup %1876 }
 0x669   : > { %v1081_v39 = vmul.f32 %v1877_v38, %v1875_v35 }
 0x66b   : > { %v1082_v23 = vpack.c.bf16 %v1081_v39, %v1081_v39 }
 0x66d   : > { %1780 = vmatmul.mubr.msk.bf16.vlgmr.msra.gmra.mrb[12].mxu1 %vm704_vm2, %v1082_v23 }
 0x66e   : > { %1790 = vmatpush3.bf16.xpose.msra.mxu1 %v1189_v41  ;;  %1791 = vmatprep.mubr.msk.bf16.mxu1 %vm1895_vm0, %v1894_v1 }
 0x66f   : > { %1801 = vmatprep.subr.bf16.mxu1 %v1894_v1 }
 0x675   : > { %1792 = vmatmul.mubr.msk.bf16.vlgmr.msra.gmra.mrb[16].mxu1 %vm704_vm2, %v1182_v42 }
 0x676   : > { %1803 = vmatprep.mubr.msk.bf16.mxu1 %vm1895_vm0, %v1894_v1  ;;  %1802 = vmatpush3.bf16.msra.mxu1 %v1298_v5 }
 0x677   : > { %1815 = vmatprep.subr.bf16.mxu1 %v1894_v1 }
 0x740   : > { %v1125_v45 = vpop.f32.mrb[12].mxu1 }
 0x741   : > { %v1131_v46 = vpack.c.bf16 %v1125_v45, %v1125_v45  ;;  %v1781_v47 = vpop.f32.mrb[13].mxu1  ;;  %v1857_v45 = vld [vmem:[%s2234_s12 + $0x8] sm:$0xff]  }
 0x742   : > { %v1128_v48 = vpop.f32.mrb[14].mxu1  ;;  %v1859_v47 = vld [vmem:[%s2236_s14 + $0x8] sm:$0xff]  }
 0x743   : > { %v1782_v49 = vpop.f32.mrb[15].mxu1  ;;  %1786 = vmatmul.mubr.msk.bf16.vlgmr.msra.gmra.mrb[24].mxu0 %vm704_vm2, %v1131_v46  ;;  %v1858_v46 = vld [vmem:[%s2236_s14] sm:$0xff]   ;;  %v1860_v48 = vld [vmem:[%s2236_s14 + $0x10] sm:$0xff]  }
 0x744   : > { %1797 = vmatprep.mubr.msk.bf16.mxu0 %vm1895_vm0, %v1894_v1  ;;  %v1861_v49 = vld [vmem:[%s2236_s14 + $0x18] sm:$0xff]  }
 0x748   : > { %v1225_v50 = vpop.f32.mrb[16].mxu1 }
 0x749   : > { %v1793_v51 = vpop.f32.mrb[17].mxu1  ;;  %v1231_v52 = vsel %vm704_vm2, %v1225_v50, -inf }
 0x74a   : > { %1232 = vmax.xlane.f32.xlu0 %v1231_v52  ;;  %v1228_v53 = vpop.f32.mrb[18].mxu1  ;;  %v1863_v51 = vld [vmem:[%s2236_s14 + $0x28] sm:$0xff]  }
 0x74b   : > { %v1794_v54 = vpop.f32.mrb[19].mxu1 }
 0x7d7   : > { %v1233_v55 = vpop.xlane.xlu0 %1232 }
 0x7d8   : > { %v1234_v56 = vsub.f32 %v1225_v50, %v1233_v55  ;;  %v1862_v50 = vld [vmem:[%s2236_s14 + $0x20] sm:$0xff]  }
 0x7da   : > { %v1235_v57 = vmul.f32 1.442695, %v1234_v56  ;;  %v1660_v56 = vld [vmem:[%s2232_s10] ss:$0 sm:$0xff] }
 0x7dc   : > { %1878 = vpow2.f32 %v1235_v57 }
 0x7e6   : > { %v1879_v58 = vpop.eup %1878 }
 0x7e7   : > { %v1237_v59 = vsel %vm704_vm2, %v1879_v58, 0.0 }
 0x7e8   : > { %1238 = vadd.xlane.f32.xlu1 %v1237_v59 }
 0x7f9   : > { %1243 = vrot.lane.b32.xlu1 %v2044_v20, %s1902_s29  ;;  %s533_s29 = scalar_lea.vmem %s2238_s16, %s2009_s27 }
 0x816   : > { %v1174_v60 = vpop.f32.mrb[24].mxu0 }
 0x817   : > { %v1180_v61 = vadd.f32 %v1174_v60, %v2101_v19  ;;  %v1787_v62 = vpop.f32.mrb[25].mxu0 }
 0x818   : > { %v1177_v63 = vpop.f32.mrb[26].mxu0  ;;  %v1864_v62 = vld [vmem:[%s2236_s14 + $0x30] sm:$0xff]  }
 0x819   : > { %v1788_v0 = vpop.f32.mrb[27].mxu0  ;;  %v1865_v63 = vld [vmem:[%s2236_s14 + $0x38] sm:$0xff]  }
 0x81a   : > { %v1662_v0 = vld [vmem:[%s2235_s13] ss:$0 sm:$0xff] }
 0x81d   : > { %540 = vadd.xlane.f32.xlu1 %v539_v2 }
 0x875   : > { %v1239_v20 = vpop.xlane.xlu1 %1238 }
 0x876   : > { %1880 = vrcp.f32 %v1239_v20 }
 0x879   : > { %v1244_v6 = vpop.permute.xlu1 %1243 }
 0x87a   : > { %v1249_v7 = vsel %vm769_vm3, %v1244_v6, 0 }
 0x87b   : > { %1796 = vmatpush3.bf16.msra.mxu0 %v1249_v7 }
 0x87c   : > { %1807 = vmatprep.subr.bf16.mxu0 %v1894_v1 }
 0x880   : > { %v1881_v8 = vpop.eup %1880 }
 0x881   : > { %v1241_v9 = vmul.f32 %v1881_v8, %v1879_v58  ;;  %v1661_v58 = vld [vmem:[%s2233_s11] ss:$0 sm:$0xff] }
 0x883   : > { %v1242_v10 = vpack.c.bf16 %v1241_v9, %v1241_v9 }
 0x885   : > { %1798 = vmatmul.mubr.msk.bf16.vlgmr.msra.gmra.mrb[28].mxu0 %vm704_vm2, %v1242_v10 }
 0x886   : > { %1811 = vmatprep.mubr.msk.bf16.mxu0 %vm1895_vm0, %v1894_v1  ;;  %1808 = vmatpush3.bf16.msra.mxu0 %v1856_v44 }
 0x887   : > { %1809 = vmatprep.subr.bf16.mxu0 %v1894_v1 }
 0x88a   : > { %1810 = vmatpush3.bf16.msra.mxu0 %v1857_v45 }
 0x8aa   : > { %v541_v11 = vpop.xlane.xlu1 %540 }
 0x8ab   : > { %v543_v12 = vmul.f32 0.03125, %v541_v11 }
 0x8ad   : > { %v544_v13 = vsub.f32 %v2016_v3, %v543_v12 }
 0x8af   : > { %v545_v14 = vmul.f32 %v544_v13, %v544_v13 }
 0x8b1   : > { %v546_v15 = vsel %vm538_vm1, %v545_v14, 0.0 }
 0x8b2   : > { %547 = vadd.xlane.f32.xlu0 %v546_v15 }
 0x93f   : > { %v548_v22 = vpop.xlane.xlu0 %547 }
 0x940   : > { %v549_v24 = vmul.f32 0.03125, %v548_v22 }
 0x942   : > { %v550_v25 = vadd.f32 1e-05, %v549_v24 }
 0x944   : > { %1882 = vrsqrt.f32 %v550_v25 }
 0x94e   : > { %v1883_v26 = vpop.eup %1882 }
 0x94f   : > { %v552_v3 = vmul.f32 %v1883_v26, %v544_v13 }
 0x951   : > { %v559_v28 = vmul.f32 %v1634_v27, %v552_v3 }
 0x953   : > { %v566_v35 = vadd.f32 %v1635_v29, %v559_v28 }
 0x958   : > { %v1285_v16 = vpop.f32.mrb[28].mxu0 }
 0x959   : > { %v1291_v17 = vpack.c.bf16 %v1285_v16, %v1285_v16  ;;  %v1799_v18 = vpop.f32.mrb[29].mxu0 }
 0x95a   : > { %v1288_v19 = vpop.f32.mrb[30].mxu0 }
 0x95b   : > { %v1800_v21 = vpop.f32.mrb[31].mxu0  ;;  %1804 = vmatmul.mubr.msk.bf16.vlgmr.msra.gmra.mrb[20].mxu1 %vm704_vm2, %v1291_v17 }
 0x95c   : > { %1831 = vmatprep.mubr.msk.bf16.mxu1 %vm1895_vm0, %v1894_v1  ;;  %1816 = vmatpush3.bf16.msra.mxu1 %v1858_v46 }
 0x95d   : > { %1817 = vmatprep.subr.bf16.mxu1 %v1894_v1 }
 0x960   : > { %1818 = vmatpush3.bf16.msra.mxu1 %v1859_v47 }
 0x961   : > { %1819 = vmatprep.subr.bf16.mxu1 %v1894_v1 }
 0x964   : > { %1820 = vmatpush3.bf16.msra.mxu1 %v1860_v48 }
 0x965   : > { %1821 = vmatprep.subr.bf16.mxu1 %v1894_v1 }
 0x968   : > { %1822 = vmatpush3.bf16.msra.mxu1 %v1861_v49 }
 0x969   : > { %1823 = vmatprep.subr.bf16.mxu1 %v1894_v1 }
 0x96c   : > { %1824 = vmatpush3.bf16.msra.mxu1 %v1862_v50 }
 0x96d   : > { %1825 = vmatprep.subr.bf16.mxu1 %v1894_v1 }
 0x970   : > { %1826 = vmatpush3.bf16.msra.mxu1 %v1863_v51 }
 0x971   : > { %1827 = vmatprep.subr.bf16.mxu1 %v1894_v1 }
 0x974   : > { %1828 = vmatpush3.bf16.msra.mxu1 %v1864_v62 }
 0x975   : > { %1829 = vmatprep.subr.bf16.mxu1 %v1894_v1  ;;  %v1666_v1 = vld [vmem:[%s2237_s15] ss:$0 sm:$0xff] }
 0x978   : > { %1830 = vmatpush3.bf16.msra.mxu1 %v1865_v63 }
 0xa2e   : > { %v1334_v30 = vpop.f32.mrb[20].mxu1 }
 0xa2f   : > { %v1340_v32 = vadd.f32 %v1334_v30, %v1180_v61  ;;  %v1805_v33 = vpop.f32.mrb[21].mxu1 }
 0xa30   : > { %v1337_v34 = vpop.f32.mrb[22].mxu1 }
 0xa31   : > { %v1348_v36 = vadd.f32 %v1659_v31, %v1340_v32  ;;  %v1806_v37 = vpop.f32.mrb[23].mxu1 }
 0xa33   : > { %v2156_v38 = vadd.f32 %v1348_v36, %v566_v35 }
 0xa35   : > { %v1352_v39 = vsel %vm538_vm1, %v2156_v38, 0.0 }
 0xa36   : > { %1353 = vadd.xlane.f32.xlu0 %v1352_v39 }
 0xac3   : > { %v1354_v40 = vpop.xlane.xlu0 %1353 }
 0xac4   : > { %v1355_v23 = vmul.f32 0.03125, %v1354_v40 }
 0xac6   : > { %v1356_v41 = vsub.f32 %v2156_v38, %v1355_v23 }
 0xac8   : > { %v1357_v42 = vmul.f32 %v1356_v41, %v1356_v41 }
 0xaca   : > { %v1358_v43 = vsel %vm538_vm1, %v1357_v42, 0.0 }
 0xacb   : > { %1359 = vadd.xlane.f32.xlu0 %v1358_v43 }
 0xb58   : > { %v1360_v52 = vpop.xlane.xlu0 %1359 }
 0xb59   : > { %v1361_v53 = vmul.f32 0.03125, %v1360_v52 }
 0xb5b   : > { %v1362_v54 = vadd.f32 1e-05, %v1361_v53 }
 0xb5d   : > { %1884 = vrsqrt.f32 %v1362_v54 }
 0xb67   : > { %v1885_v55 = vpop.eup %1884 }
 0xb68   : > { %v1364_v57 = vmul.f32 %v1885_v55, %v1356_v41 }
 0xb6a   : > { %v1371_v59 = vmul.f32 %v1660_v56, %v1364_v57 }
 0xb6c   : > { %v1378_v60 = vadd.f32 %v1661_v58, %v1371_v59 }
 0xb6e   : > { %v1379_v61 = vpack.c.bf16 %v1378_v60, %v1378_v60 }
 0xb70   : > { %1812 = vmatmul.mubr.msk.bf16.vlgmr.msra.gmra.mrb[32].mxu0 %vm538_vm1, %v1379_v61 }
 0xc43   : > { %v1440_v2 = vpop.f32.mrb[32].mxu0 }
 0xc44   : > { %v1441_v4 = vadd.f32 %v1662_v0, %v1440_v2  ;;  %v1813_v5 = vpop.f32.mrb[33].mxu0 }
 0xc45   : > { %v1443_v20 = vpop.f32.mrb[34].mxu0 }
 0xc46   : > { %v1446_v6 = vmax.f32 %v1441_v4, 0.0  ;;  %v1814_v7 = vpop.f32.mrb[35].mxu0 }
 0xc48   : > { %v1447_v8 = vpack.c.bf16 %v1446_v6, %v1446_v6 }
 0xc4a   : > { %1832 = vmatmul.mubr.bf16.vlgmr.msra.gmra.mrb[24].mxu1 %v1447_v8 }
 0xd1d   : > { %v1553_v9 = vpop.f32.mrb[24].mxu1 }
 0xd1e   : > { %v1554_v10 = vadd.f32 %v1666_v1, %v1553_v9  ;;  %v1833_v11 = vpop.f32.mrb[25].mxu1 }
 0xd1f   : > { %v1556_v12 = vpop.f32.mrb[26].mxu1 }
 0xd20   : > { %v1559_v13 = vadd.f32 %v1554_v10, %v2156_v38  ;;  %v1834_v14 = vpop.f32.mrb[27].mxu1 }
 0xd22   : > { %1560 = vst.msk [vmem:[%s533_s29] sm:$0xff] %vm538_vm1, %v1559_v13 }
 0xd23 PF: > { %s26_s21 = sadd.s32 1, %s1892_s21  }
 0xd24   : > { %p23_p4 = scmp.ge.s32.totalorder %s26_s21, 4  }
 0xd26   :  { %25 = sbr.rel (!%p23_p4) target bundleno = 2 (0x2), region = 120 }

// kernel: forward.2
= control target key start
LH: loop header
LB: loop body
LE: loop exit
PB: predicated region body
PF: predicated region fallthrough
CT: control target
= control target key end

     0   :  { %s1989_s21 = smov 0   ;;  %s2228_s0 = inlined_call_operand.vmem [shape: f32[2,8,32], index: 0, kind: input, shape index: {}]   ;;  %s2229_s1 = inlined_call_operand.vmem [shape: f32[2,8,32], index: 1, kind: input, shape index: {}]   ;;  %s2230_s2 = inlined_call_operand.vmem [shape: f32[1,32], index: 2, kind: input, shape index: {}]   ;;  %s2231_s3 = inlined_call_operand.vmem [shape: f32[1,32], index: 3, kind: input, shape index: {}]   ;;  %s2232_s4 = inlined_call_operand.vmem [shape: bf16[32,64], index: 4, kind: input, shape index: {}]   ;;  %s2233_s5 = inlined_call_operand.vmem [shape: f32[1,64], index: 5, kind: input, shape index: {}]   ;;  %s2234_s6 = inlined_call_operand.vmem [shape: bf16[32,32], index: 6, kind: input, shape index: {}]   ;;  %s2235_s7 = inlined_call_operand.vmem [shape: f32[1,32], index: 7, kind: input, shape index: {}]   ;;  %s2236_s8 = inlined_call_operand.vmem [shape: bf16[4,8,32], index: 8, kind: input, shape index: {}]   ;;  %s2237_s9 = inlined_call_operand.vmem [shape: f32[1,32], index: 9, kind: input, shape index: {}]   ;;  %s2238_s10 = inlined_call_operand.vmem [shape: f32[1,32], index: 10, kind: input, shape index: {}]   ;;  %s2239_s11 = inlined_call_operand.vmem [shape: f32[1,32], index: 11, kind: input, shape index: {}]   ;;  %s2240_s12 = inlined_call_operand.vmem [shape: bf16[32,128], index: 12, kind: input, shape index: {}]   ;;  %s2241_s13 = inlined_call_operand.vmem [shape: f32[1,128], index: 13, kind: input, shape index: {}]   ;;  %s2242_s14 = inlined_call_operand.vmem [shape: bf16[128,32], index: 14, kind: input, shape index: {}]   ;;  %s2243_s15 = inlined_call_operand.vmem [shape: f32[1,32], index: 15, kind: input, shape index: {}]   ;;  %s2244_s16 = inlined_call_operand.vmem [shape: f32[2,8,32], index: 16, kind: output, shape index: {}]  }
   0x1   :  { %2245 = sst [smem:[#allocation2_spill]] %s2228_s0 }
   0x2 LB: > { %s1627_s22 = sadd.s32 4294967295, %s1893_s21   ;;  %p1631_p0 = scmp.ge.s32.totalorder %s1893_s21, 1  ;;  %s1893_s21 = sphi %s1989_s21, %s26_s21  }
   0x3   : > { %p470_p1 = scmp.lt.s32.totalorder %s1893_s21, 3 }
   0x5   : > { %p471_p2 = pnand %p1631_p0, %p470_p1 }
   0x6   : > { %p522_p3 = scmp.lt.s32.totalorder (!%p471_p2), %s1627_s22, 1  ;;  %vm538_vm0 = vcmask (!%p471_p2), 261120   ;;  %s2246_s26 = sld [smem:[#allocation2_spill]] (!%p471_p2)  ;;  %v1853_v7 = vld [vmem:[%s2232_s4] sm:$0xff] (!%p471_p2)   ;;  %v1895_v8 = vmov (!%p471_p2), 0.0   ;;  %vm1896_vm1 = vmmov (!%p471_p2), 0  }
   0x7   : > { %474 = sbr.rel (%p471_p2) target bundleno = 3678 (0xe5e), region = 84  ;;  %1720 = vmatprep.subr.bf16.mxu0 (!%p471_p2), %v1895_v8  ;;  %1724 = vmatprep.mubr.msk.bf16.mxu0 (!%p471_p2), %vm1896_vm1, %v1895_v8  ;;  %v1854_v9 = vld [vmem:[%s2232_s4 + $0x8] sm:$0xff] (!%p471_p2)   ;;  %v1635_v14 = vld [vmem:[%s2230_s2] ss:$0 sm:$0xff] (!%p471_p2)  ;;  %s1897_s17 = smov (!%p471_p2), 120   ;;  %vm770_vm2 = vcmask (!%p471_p2), 1043456  }
   0x8   : > { %1721 = vmatpush3.bf16.msra.mxu0 (!%p471_p2), %v1853_v7  ;;  %1742 = vmatprep.subr.bf16.mxu1 (!%p471_p2), %v1895_v8  ;;  %v1636_v16 = vld [vmem:[%s2231_s3] ss:$0 sm:$0xff] (!%p471_p2)  ;;  %v1856_v23 = vld [vmem:[%s2234_s6 + $0x8] sm:$0xff] (!%p471_p2)   ;;  %s1898_s18 = smov (!%p471_p2), 96   ;;  %vm708_vm3 = vcmask (!%p471_p2), 64512   ;;  %s1900_s24 = smov (!%p471_p2), 80  }
   0x9   : > { %1722 = vmatprep.subr.bf16.mxu0 (!%p471_p2), %v1895_v8  ;;  %1744 = vmatprep.mubr.msk.bf16.mxu1 (!%p471_p2), %vm1896_vm1, %v1895_v8  ;;  %v1855_v21 = vld [vmem:[%s2234_s6] sm:$0xff] (!%p471_p2)   ;;  %s1901_s25 = smov (!%p471_p2), 112   ;;  %s1902_s30 = smov (!%p471_p2), 104  }
   0xa   : > { %v1637_v25 = vld [vmem:[%s2233_s5] ss:$0 sm:$0xff] (!%p471_p2)  ;;  %s1903_s0 = smov (!%p471_p2), 72  }
   0xb   : > { %v1641_v32 = vld [vmem:[%s2235_s7] ss:$0 sm:$0xff] (!%p471_p2) }
   0xc   : > { %1723 = vmatpush3.bf16.msra.mxu0 (!%p471_p2), %v1854_v9 }
   0xd   : > { %1728 = vmatprep.subr.bf16.mxu0 (!%p471_p2), %v1895_v8 }
   0xe   : > { %s2248_s22 = smov (!%p522_p3, %s1627_s22), 1 }
   0xf   : > { %s1997_s23 = sshll.u32 %s2248_s22, 3 }
  0x10   : > { %s525_s27 = scalar_lea.vmem %s2246_s26, %s1997_s23  ;;  %s529_s22 = scalar_lea.vmem %s2229_s1, %s1997_s23 }
  0x11   : > { %v2003_v0 = vld [vmem:[%s525_s27] sm:$0xff]  ;;  %s533_s29 = scalar_lea.vmem %s2244_s16, %s1997_s23 }
  0x12   : > { %v539_v1 = vsel %vm538_vm0, %v2003_v0, 0.0  ;;  %v567_v18 = vld [vmem:[%s529_s22] sm:$0xff]  ;;  %s1899_s22 = smov 88  }
  0x13   : > { %540 = vadd.xlane.f32.xlu0 %v539_v1 }
  0xa0   : > { %v541_v2 = vpop.xlane.xlu0 %540 }
  0xa1   : > { %v543_v3 = vmul.f32 0.03125, %v541_v2 }
  0xa3   : > { %v544_v4 = vsub.f32 %v2003_v0, %v543_v3 }
  0xa5   : > { %v545_v5 = vmul.f32 %v544_v4, %v544_v4 }
  0xa7   : > { %v546_v6 = vsel %vm538_vm0, %v545_v5, 0.0 }
  0xa8   : > { %547 = vadd.xlane.f32.xlu0 %v546_v6 }
 0x135   : > { %v548_v10 = vpop.xlane.xlu0 %547 }
 0x136   : > { %v549_v11 = vmul.f32 0.03125, %v548_v10 }
 0x138   : > { %v550_v12 = vadd.f32 1e-05, %v549_v11 }
 0x13a   : > { %1867 = vrsqrt.f32 %v550_v12 }
 0x144   : > { %v1868_v13 = vpop.eup %1867 }
 0x145   : > { %v552_v15 = vmul.f32 %v1868_v13, %v544_v4  ;;  %v815_v13 = vld [vmem:[%s2236_s8] sm:$0xf] }
 0x147   : > { %v559_v17 = vmul.f32 %v1635_v14, %v552_v15  ;;  %v980_v14 = vsel %vm770_vm2, %v815_v13, 0  ;;  %v1649_v15 = vld [vmem:[%s2236_s8 + $0x4] sm:$0xf] }
 0x149   : > { %v566_v19 = vadd.f32 %v1636_v16, %v559_v17  ;;  %v934_v16 = vsel %vm770_vm2, %v1649_v15, 0 }
 0x14b   : > { %v568_v20 = vadd.f32 %v567_v18, %v566_v19  ;;  %v636_v24 = vpack.c.bf16 %v566_v19, %v566_v19 }
 0x14d   : > { %v569_v22 = vpack.c.bf16 %v568_v20, %v568_v20 }
 0x14f   : > { %1725 = vmatmul.mubr.msk.bf16.vlgmr.msra.gmra.mrb[0].mxu0 %vm538_vm0, %v569_v22 }
 0x150   : > { %1729 = vmatpush3.bf16.msra.mxu0 %v1855_v21  ;;  %1732 = vmatprep.mubr.msk.bf16.mxu0 %vm1896_vm1, %v1895_v8 }
 0x151   : > { %1730 = vmatprep.subr.bf16.mxu0 %v1895_v8 }
 0x154   : > { %1731 = vmatpush3.bf16.msra.mxu0 %v1856_v23 }
 0x155   : > { %1736 = vmatprep.subr.bf16.mxu0 %v1895_v8 }
 0x157   : > { %1733 = vmatmul.mubr.msk.bf16.vlgmr.msra.gmra.mrb[4].mxu0 %vm538_vm0, %v636_v24 }
 0x158   : > { %1738 = vmatprep.mubr.msk.bf16.mxu0 %vm1896_vm1, %v1895_v8 }
 0x222   : > { %v630_v26 = vpop.f32.mrb[0].mxu0 }
 0x223   : > { %v631_v27 = vadd.f32 %v1637_v25, %v630_v26  ;;  %v1726_v28 = vpop.f32.mrb[1].mxu0 }
 0x224   : > { %v633_v29 = vpop.f32.mrb[2].mxu0 }
 0x225   : > { %v2050_v30 = vpack.c.bf16 %v631_v27, %v631_v27  ;;  %v1727_v31 = vpop.f32.mrb[3].mxu0 }
 0x227   : > { %816 = vrot.lane.b32.xlu0 %v2050_v30, %s1897_s17  ;;  %706 = vrot.lane.b32.xlu1 %v2050_v30, %s1898_s18 }
 0x22a   : > { %v697_v33 = vpop.f32.mrb[4].mxu0 }
 0x22b   : > { %v698_v34 = vadd.f32 %v1641_v32, %v697_v33  ;;  %818 = vrot.lane.b32.xlu1 %v2050_v30, %s1899_s22  ;;  %v1734_v35 = vpop.f32.mrb[5].mxu0 }
 0x22c   : > { %v700_v36 = vpop.f32.mrb[6].mxu0 }
 0x22d   : > { %v2059_v37 = vpack.c.bf16 %v698_v34, %v698_v34  ;;  %v1735_v38 = vpop.f32.mrb[7].mxu0 }
 0x22f   : > { %v772_v39 = vsel %vm770_vm2, %v2059_v37, 0 }
 0x230   : > { %1743 = vmatpush3.bf16.msra.mxu1 %v772_v39 }
 0x231   : > { %1754 = vmatprep.subr.bf16.mxu1 %v1895_v8 }
 0x299   : > { %v707_v40 = vpop.permute.xlu1 %706  ;;  %v817_v44 = vpop.permute.xlu0 %816 }
 0x29a   : > { %v713_v41 = vsel %vm708_vm3, %v707_v40, 0 }
 0x29b   : > { %1737 = vmatpush3.bf16.xpose.msra.mxu0 %v713_v41 }
 0x29c   : > { %1748 = vmatprep.subr.bf16.mxu0 %v1895_v8 }
 0x29d   : > { %v819_v42 = vpop.permute.xlu1 %818 }
 0x29e   : > { %v824_v43 = vsel %vm708_vm3, %v819_v42, 0 }
 0x2a2   : > { %1739 = vmatmul.mubr.msk.bf16.vlgmr.msra.gmra.mrb[8].mxu0 %vm708_vm3, %v2050_v30 }
 0x2a3   : > { %1749 = vmatpush3.bf16.xpose.msra.mxu0 %v824_v43  ;;  %1750 = vmatprep.mubr.msk.bf16.mxu0 %vm1896_vm1, %v1895_v8 }
 0x2a4   : > { %1760 = vmatprep.subr.bf16.mxu0 %v1895_v8 }
 0x2aa   : > { %1751 = vmatmul.mubr.msk.bf16.vlgmr.msra.gmra.mrb[12].mxu0 %vm708_vm3, %v817_v44 }
 0x2ab   : > { %1762 = vmatprep.mubr.msk.bf16.mxu0 %vm1896_vm1, %v1895_v8  ;;  %1761 = vmatpush3.bf16.msra.mxu0 %v934_v16  ;;  %v1658_v16 = vld [vmem:[%s2236_s8 + $0xc] sm:$0xf] }
 0x2ac   : > { %1772 = vmatprep.subr.bf16.mxu0 %v1895_v8 }
 0x375   : > { %v749_v45 = vpop.f32.mrb[8].mxu0 }
 0x376   : > { %v1740_v46 = vpop.f32.mrb[9].mxu0  ;;  %v755_v47 = vsel %vm708_vm3, %v749_v45, -inf }
 0x377   : > { %756 = vmax.xlane.f32.xlu1 %v755_v47  ;;  %v752_v48 = vpop.f32.mrb[10].mxu0 }
 0x378   : > { %v1741_v49 = vpop.f32.mrb[11].mxu0 }
 0x37d   : > { %v860_v50 = vpop.f32.mrb[12].mxu0 }
 0x37e   : > { %v1752_v51 = vpop.f32.mrb[13].mxu0  ;;  %v866_v52 = vsel %vm708_vm3, %v860_v50, -inf }
 0x37f   : > { %867 = vmax.xlane.f32.xlu0 %v866_v52  ;;  %v863_v53 = vpop.f32.mrb[14].mxu0 }
 0x380   : > { %v1753_v54 = vpop.f32.mrb[15].mxu0 }
 0x395   : > { %1024 = vrot.lane.b32.xlu0 %v2050_v30, %s1900_s24 }
 0x404   : > { %v757_v55 = vpop.xlane.xlu1 %756 }
 0x405   : > { %v758_v56 = vsub.f32 %v749_v45, %v757_v55 }
 0x407   : > { %v759_v57 = vmul.f32 1.442695, %v758_v56 }
 0x409   : > { %1869 = vpow2.f32 %v759_v57 }
 0x40c   : > { %v868_v58 = vpop.xlane.xlu0 %867 }
 0x40d   : > { %v869_v59 = vsub.f32 %v860_v50, %v868_v58 }
 0x40f   : > { %v870_v60 = vmul.f32 1.442695, %v869_v59 }
 0x410   : > { %v1025_v22 = vpop.permute.xlu0 %1024 }
 0x411   : > { %1871 = vpow2.f32 %v870_v60  ;;  %v1030_v27 = vsel %vm708_vm3, %v1025_v22, 0 }
 0x413   : > { %v1870_v61 = vpop.eup %1869 }
 0x414   : > { %v761_v62 = vsel %vm708_vm3, %v1870_v61, 0.0 }
 0x415   : > { %762 = vadd.xlane.f32.xlu1 %v761_v62 }
 0x41b   : > { %v1872_v63 = vpop.eup %1871 }
 0x41c   : > { %v872_v1 = vsel %vm708_vm3, %v1872_v63, 0.0 }
 0x41d   : > { %873 = vadd.xlane.f32.xlu1 %v872_v1 }
 0x42e   : > { %879 = vrot.lane.b32.xlu1 %v2059_v37, %s1897_s17 }
 0x432   : > { %1022 = vrot.lane.b32.xlu1 %v2050_v30, %s1901_s25 }
 0x4a2   : > { %v763_v2 = vpop.xlane.xlu1 %762 }
 0x4a3   : > { %1873 = vrcp.f32 %v763_v2 }
 0x4aa   : > { %v874_v3 = vpop.xlane.xlu1 %873 }
 0x4ab   : > { %1875 = vrcp.f32 %v874_v3 }
 0x4ad   : > { %v1874_v4 = vpop.eup %1873 }
 0x4ae   : > { %v765_v5 = vmul.f32 %v1874_v4, %v1870_v61  ;;  %v880_v6 = vpop.permute.xlu1 %879 }
 0x4af   : > { %v885_v9 = vsel %vm770_vm2, %v880_v6, 0 }
 0x4b0   : > { %v766_v7 = vpack.c.bf16 %v765_v5, %v765_v5 }
 0x4b2   : > { %1745 = vmatmul.mubr.msk.bf16.vlgmr.msra.gmra.mrb[0].mxu1 %vm708_vm3, %v766_v7  ;;  %v1023_v29 = vpop.permute.xlu1 %1022 }
 0x4b3   : > { %1755 = vmatpush3.bf16.msra.mxu1 %v885_v9  ;;  %1756 = vmatprep.mubr.msk.bf16.mxu1 %vm1896_vm1, %v1895_v8 }
 0x4b4   : > { %1766 = vmatprep.subr.bf16.mxu1 %v1895_v8 }
 0x4b5   : > { %v1876_v10 = vpop.eup %1875 }
 0x4b6   : > { %v876_v11 = vmul.f32 %v1876_v10, %v1872_v63 }
 0x4b8   : > { %v877_v12 = vpack.c.bf16 %v876_v11, %v876_v11 }
 0x4ba   : > { %1757 = vmatmul.mubr.msk.bf16.vlgmr.msra.gmra.mrb[4].mxu1 %vm708_vm3, %v877_v12 }
 0x4bb   : > { %1768 = vmatprep.mubr.msk.bf16.mxu1 %vm1896_vm1, %v1895_v8  ;;  %1767 = vmatpush3.bf16.msra.mxu1 %v980_v14 }
 0x4bc   : > { %1778 = vmatprep.subr.bf16.mxu1 %v1895_v8 }
 0x585   : > { %v808_v17 = vpop.f32.mrb[0].mxu1 }
 0x586   : > { %v814_v18 = vpack.c.bf16 %v808_v17, %v808_v17  ;;  %v1746_v19 = vpop.f32.mrb[1].mxu1 }
 0x587   : > { %v811_v20 = vpop.f32.mrb[2].mxu1 }
 0x588   : > { %v1747_v21 = vpop.f32.mrb[3].mxu1  ;;  %1769 = vmatmul.mubr.msk.bf16.vlgmr.msra.gmra.mrb[8].mxu1 %vm708_vm3, %v814_v18 }
 0x589   : > { %1780 = vmatprep.mubr.msk.bf16.mxu1 %vm1896_vm1, %v1895_v8 }
 0x58d   : > { %v921_v23 = vpop.f32.mrb[4].mxu1 }
 0x58e   : > { %v927_v24 = vpack.c.bf16 %v921_v23, %v921_v23  ;;  %v1758_v25 = vpop.f32.mrb[5].mxu1 }
 0x58f   : > { %v924_v26 = vpop.f32.mrb[6].mxu1 }
 0x590   : > { %v1759_v28 = vpop.f32.mrb[7].mxu1  ;;  %1763 = vmatmul.mubr.msk.bf16.vlgmr.msra.gmra.mrb[16].mxu0 %vm708_vm3, %v927_v24 }
 0x591   : > { %1773 = vmatpush3.bf16.xpose.msra.mxu0 %v1030_v27  ;;  %1774 = vmatprep.mubr.msk.bf16.mxu0 %vm1896_vm1, %v1895_v8 }
 0x592   : > { %1784 = vmatprep.subr.bf16.mxu0 %v1895_v8 }
 0x598   : > { %1775 = vmatmul.mubr.msk.bf16.vlgmr.msra.gmra.mrb[20].mxu0 %vm708_vm3, %v1023_v29 }
 0x599   : > { %1786 = vmatprep.mubr.msk.bf16.mxu0 %vm1896_vm1, %v1895_v8 }
 0x65b   : > { %v1016_v31 = vpop.f32.mrb[8].mxu1 }
 0x65c   : > { %v1770_v32 = vpop.f32.mrb[9].mxu1 }
 0x65d   : > { %v1019_v33 = vpop.f32.mrb[10].mxu1 }
 0x65e   : > { %v1771_v34 = vpop.f32.mrb[11].mxu1  ;;  %v1660_v33 = vld [vmem:[%s2237_s9] ss:$0 sm:$0xff] }
 0x663   : > { %v970_v35 = vpop.f32.mrb[16].mxu0 }
 0x664   : > { %v2113_v36 = vadd.f32 %v1016_v31, %v970_v35  ;;  %v1764_v38 = vpop.f32.mrb[17].mxu0 }
 0x665   : > { %v973_v39 = vpop.f32.mrb[18].mxu0 }
 0x666   : > { %v1765_v40 = vpop.f32.mrb[19].mxu0 }
 0x66b   : > { %v1066_v41 = vpop.f32.mrb[20].mxu0 }
 0x66c   : > { %v1776_v42 = vpop.f32.mrb[21].mxu0  ;;  %v1072_v43 = vsel %vm708_vm3, %v1066_v41, -inf }
 0x66d   : > { %1073 = vmax.xlane.f32.xlu1 %v1072_v43  ;;  %v1069_v44 = vpop.f32.mrb[22].mxu0 }
 0x66e   : > { %v1777_v45 = vpop.f32.mrb[23].mxu0 }
 0x67e   : > { %1084 = vrot.lane.b32.xlu1 %v2059_v37, %s1901_s25 }
 0x682   : > { %1182 = vrot.lane.b32.xlu1 %v2050_v30, %s1902_s30 }
 0x6fa   : > { %v1074_v46 = vpop.xlane.xlu1 %1073 }
 0x6fb   : > { %v1075_v47 = vsub.f32 %v1066_v41, %v1074_v46 }
 0x6fd   : > { %v1076_v48 = vmul.f32 1.442695, %v1075_v47  ;;  %v1857_v47 = vld [vmem:[%s2240_s12] sm:$0xff]  }
 0x6fe   : > { %v1085_v49 = vpop.permute.xlu1 %1084 }
 0x6ff   : > { %1877 = vpow2.f32 %v1076_v48  ;;  %v1090_v50 = vsel %vm770_vm2, %v1085_v49, 0  ;;  %v1859_v48 = vld [vmem:[%s2242_s14] sm:$0xff]   ;;  %v1860_v49 = vld [vmem:[%s2242_s14 + $0x8] sm:$0xff]  }
 0x700   : > { %1779 = vmatpush3.bf16.msra.mxu1 %v1090_v50  ;;  %v1861_v50 = vld [vmem:[%s2242_s14 + $0x10] sm:$0xff]  }
 0x701   : > { %1790 = vmatprep.subr.bf16.mxu1 %v1895_v8 }
 0x702   : > { %v1183_v59 = vpop.permute.xlu1 %1182 }
 0x709   : > { %v1878_v51 = vpop.eup %1877 }
 0x70a   : > { %v1078_v52 = vsel %vm708_vm3, %v1878_v51, 0.0 }
 0x70b   : > { %1079 = vadd.xlane.f32.xlu0 %v1078_v52  ;;  %v1863_v52 = vld [vmem:[%s2242_s14 + $0x20] sm:$0xff]  }
 0x721   : > { %1184 = vrot.lane.b32.xlu0 %v2050_v30, %s1903_s0  ;;  %v1654_v30 = vld [vmem:[%s2236_s8 + $0x8] sm:$0xf] }
 0x722   : > { %v1139_v60 = vsel %vm770_vm2, %v1654_v30, 0  ;;  %v1662_v30 = vld [vmem:[%s2239_s11] ss:$0 sm:$0xff] }
 0x723   : > { %1785 = vmatpush3.bf16.msra.mxu0 %v1139_v60 }
 0x724   : > { %1796 = vmatprep.subr.bf16.mxu0 %v1895_v8 }
 0x798   : > { %v1080_v53 = vpop.xlane.xlu0 %1079 }
 0x799   : > { %1879 = vrcp.f32 %v1080_v53  ;;  %v1864_v53 = vld [vmem:[%s2242_s14 + $0x28] sm:$0xff]  }
 0x79c   : > { %v1185_v56 = vpop.permute.xlu0 %1184 }
 0x79d   : > { %v1190_v58 = vsel %vm708_vm3, %v1185_v56, 0 }
 0x7a3   : > { %v1880_v54 = vpop.eup %1879 }
 0x7a4   : > { %v1082_v55 = vmul.f32 %v1880_v54, %v1878_v51  ;;  %v1862_v51 = vld [vmem:[%s2242_s14 + $0x18] sm:$0xff]  }
 0x7a6   : > { %v1083_v57 = vpack.c.bf16 %v1082_v55, %v1082_v55 }
 0x7a8   : > { %1781 = vmatmul.mubr.msk.bf16.vlgmr.msra.gmra.mrb[12].mxu1 %vm708_vm3, %v1083_v57 }
 0x7a9   : > { %1791 = vmatpush3.bf16.xpose.msra.mxu1 %v1190_v58  ;;  %1792 = vmatprep.mubr.msk.bf16.mxu1 %vm1896_vm1, %v1895_v8  ;;  %v1661_v58 = vld [vmem:[%s2238_s10] ss:$0 sm:$0xff] }
 0x7aa   : > { %1802 = vmatprep.subr.bf16.mxu1 %v1895_v8 }
 0x7b0   : > { %1793 = vmatmul.mubr.msk.bf16.vlgmr.msra.gmra.mrb[16].mxu1 %vm708_vm3, %v1183_v59 }
 0x7b1   : > { %1804 = vmatprep.mubr.msk.bf16.mxu1 %vm1896_vm1, %v1895_v8 }
 0x87b   : > { %v1126_v61 = vpop.f32.mrb[12].mxu1 }
 0x87c   : > { %v1132_v62 = vpack.c.bf16 %v1126_v61, %v1126_v61  ;;  %v1782_v63 = vpop.f32.mrb[13].mxu1 }
 0x87d   : > { %v1129_v1 = vpop.f32.mrb[14].mxu1  ;;  %v1865_v63 = vld [vmem:[%s2242_s14 + $0x30] sm:$0xff]  }
 0x87e   : > { %v1783_v2 = vpop.f32.mrb[15].mxu1  ;;  %1787 = vmatmul.mubr.msk.bf16.vlgmr.msra.gmra.mrb[24].mxu0 %vm708_vm3, %v1132_v62  ;;  %v1866_v1 = vld [vmem:[%s2242_s14 + $0x38] sm:$0xff]  }
 0x87f   : > { %1798 = vmatprep.mubr.msk.bf16.mxu0 %vm1896_vm1, %v1895_v8  ;;  %v1663_v2 = vld [vmem:[%s2241_s13] ss:$0 sm:$0xff] }
 0x883   : > { %v1226_v3 = vpop.f32.mrb[16].mxu1 }
 0x884   : > { %v1794_v4 = vpop.f32.mrb[17].mxu1  ;;  %v1232_v5 = vsel %vm708_vm3, %v1226_v3, -inf }
 0x885   : > { %1233 = vmax.xlane.f32.xlu1 %v1232_v5  ;;  %v1229_v6 = vpop.f32.mrb[18].mxu1 }
 0x886   : > { %v1795_v7 = vpop.f32.mrb[19].mxu1 }
 0x896   : > { %1244 = vrot.lane.b32.xlu1 %v2059_v37, %s1902_s30  ;;  %v1299_v37 = vsel %vm770_vm2, %v1658_v16, 0 }
 0x897   : > { %1803 = vmatpush3.bf16.msra.mxu1 %v1299_v37 }
 0x898   : > { %1816 = vmatprep.subr.bf16.mxu1 %v1895_v8 }
 0x912   : > { %v1234_v9 = vpop.xlane.xlu1 %1233 }
 0x913   : > { %v1235_v10 = vsub.f32 %v1226_v3, %v1234_v9 }
 0x915   : > { %v1236_v11 = vmul.f32 1.442695, %v1235_v10 }
 0x916   : > { %v1245_v12 = vpop.permute.xlu1 %1244 }
 0x917   : > { %1881 = vpow2.f32 %v1236_v11  ;;  %v1250_v13 = vsel %vm770_vm2, %v1245_v12, 0 }
 0x918   : > { %1797 = vmatpush3.bf16.msra.mxu0 %v1250_v13 }
 0x919   : > { %1808 = vmatprep.subr.bf16.mxu0 %v1895_v8 }
 0x921   : > { %v1882_v14 = vpop.eup %1881 }
 0x922   : > { %v1238_v15 = vsel %vm708_vm3, %v1882_v14, 0.0 }
 0x923   : > { %1239 = vadd.xlane.f32.xlu0 %v1238_v15 }
 0x951   : > { %v1175_v17 = vpop.f32.mrb[24].mxu0 }
 0x952   : > { %v1181_v18 = vadd.f32 %v1175_v17, %v2113_v36  ;;  %v1788_v19 = vpop.f32.mrb[25].mxu0 }
 0x953   : > { %v1178_v20 = vpop.f32.mrb[26].mxu0 }
 0x954   : > { %v1789_v21 = vpop.f32.mrb[27].mxu0 }
 0x9b0   : > { %v1240_v22 = vpop.xlane.xlu0 %1239 }
 0x9b1   : > { %1883 = vrcp.f32 %v1240_v22 }
 0x9bb   : > { %v1884_v23 = vpop.eup %1883 }
 0x9bc   : > { %v1242_v24 = vmul.f32 %v1884_v23, %v1882_v14 }
 0x9be   : > { %v1243_v25 = vpack.c.bf16 %v1242_v24, %v1242_v24 }
 0x9c0   : > { %1799 = vmatmul.mubr.msk.bf16.vlgmr.msra.gmra.mrb[28].mxu0 %vm708_vm3, %v1243_v25 }
 0x9c1   : > { %1812 = vmatprep.mubr.msk.bf16.mxu0 %vm1896_vm1, %v1895_v8  ;;  %1809 = vmatpush3.bf16.msra.mxu0 %v1857_v47 }
 0x9c2   : > { %1810 = vmatprep.subr.bf16.mxu0 %v1895_v8 }
 0xa93   : > { %v1286_v26 = vpop.f32.mrb[28].mxu0 }
 0xa94   : > { %v1292_v27 = vpack.c.bf16 %v1286_v26, %v1286_v26  ;;  %v1800_v28 = vpop.f32.mrb[29].mxu0 }
 0xa95   : > { %v1289_v29 = vpop.f32.mrb[30].mxu0 }
 0xa96   : > { %v1801_v31 = vpop.f32.mrb[31].mxu0  ;;  %1805 = vmatmul.mubr.msk.bf16.vlgmr.msra.gmra.mrb[20].mxu1 %vm708_vm3, %v1292_v27 }
 0xa97   : > { %1832 = vmatprep.mubr.msk.bf16.mxu1 %vm1896_vm1, %v1895_v8  ;;  %1817 = vmatpush3.bf16.msra.mxu1 %v1859_v48 }
 0xa98   : > { %1818 = vmatprep.subr.bf16.mxu1 %v1895_v8 }
 0xa9b   : > { %1819 = vmatpush3.bf16.msra.mxu1 %v1860_v49 }
 0xa9c   : > { %1820 = vmatprep.subr.bf16.mxu1 %v1895_v8 }
 0xa9f   : > { %1821 = vmatpush3.bf16.msra.mxu1 %v1861_v50 }
 0xaa0   : > { %1822 = vmatprep.subr.bf16.mxu1 %v1895_v8 }
 0xaa3   : > { %1823 = vmatpush3.bf16.msra.mxu1 %v1862_v51 }
 0xaa4   : > { %1824 = vmatprep.subr.bf16.mxu1 %v1895_v8 }
 0xaa7   : > { %1825 = vmatpush3.bf16.msra.mxu1 %v1863_v52 }
 0xaa8   : > { %1826 = vmatprep.subr.bf16.mxu1 %v1895_v8 }
 0xaab   : > { %1827 = vmatpush3.bf16.msra.mxu1 %v1864_v53 }
 0xaac   : > { %1828 = vmatprep.subr.bf16.mxu1 %v1895_v8 }
 0xaaf   : > { %1829 = vmatpush3.bf16.msra.mxu1 %v1865_v63 }
 0xab0   : > { %1830 = vmatprep.subr.bf16.mxu1 %v1895_v8  ;;  %v1667_v8 = vld [vmem:[%s2243_s15] ss:$0 sm:$0xff] }
 0xab3   : > { %1831 = vmatpush3.bf16.msra.mxu1 %v1866_v1 }
 0xb69   : > { %v1335_v32 = vpop.f32.mrb[20].mxu1 }
 0xb6a   : > { %v1341_v34 = vadd.f32 %v1335_v32, %v1181_v18  ;;  %v1806_v35 = vpop.f32.mrb[21].mxu1 }
 0xb6b   : > { %v1338_v36 = vpop.f32.mrb[22].mxu1 }
 0xb6c   : > { %v1349_v38 = vadd.f32 %v1660_v33, %v1341_v34  ;;  %v1807_v39 = vpop.f32.mrb[23].mxu1 }
 0xb6e   : > { %v2162_v40 = vadd.f32 %v1349_v38, %v2003_v0  ;;  %v1858_v0 = vld [vmem:[%s2240_s12 + $0x8] sm:$0xff]  }
 0xb6f   : > { %1811 = vmatpush3.bf16.msra.mxu0 %v1858_v0 }
 0xb70   : > { %v1353_v41 = vsel %vm538_vm0, %v2162_v40, 0.0 }
 0xb71   : > { %1354 = vadd.xlane.f32.xlu0 %v1353_v41 }
 0xbfe   : > { %v1355_v42 = vpop.xlane.xlu0 %1354 }
 0xbff   : > { %v1356_v43 = vmul.f32 0.03125, %v1355_v42 }
 0xc01   : > { %v1357_v44 = vsub.f32 %v2162_v40, %v1356_v43 }
 0xc03   : > { %v1358_v45 = vmul.f32 %v1357_v44, %v1357_v44 }
 0xc05   : > { %v1359_v46 = vsel %vm538_vm0, %v1358_v45, 0.0 }
 0xc06   : > { %1360 = vadd.xlane.f32.xlu0 %v1359_v46 }
 0xc93   : > { %v1361_v54 = vpop.xlane.xlu0 %1360 }
 0xc94   : > { %v1362_v55 = vmul.f32 0.03125, %v1361_v54 }
 0xc96   : > { %v1363_v56 = vadd.f32 1e-05, %v1362_v55 }
 0xc98   : > { %1885 = vrsqrt.f32 %v1363_v56 }
 0xca2   : > { %v1886_v57 = vpop.eup %1885 }
 0xca3   : > { %v1365_v59 = vmul.f32 %v1886_v57, %v1357_v44 }
 0xca5   : > { %v1372_v60 = vmul.f32 %v1661_v58, %v1365_v59 }
 0xca7   : > { %v1379_v61 = vadd.f32 %v1662_v30, %v1372_v60 }
 0xca9   : > { %v1380_v62 = vpack.c.bf16 %v1379_v61, %v1379_v61 }
 0xcab   : > { %1813 = vmatmul.mubr.msk.bf16.vlgmr.msra.gmra.mrb[32].mxu0 %vm538_vm0, %v1380_v62 }
 0xd7e   : > { %v1441_v3 = vpop.f32.mrb[32].mxu0 }
 0xd7f   : > { %v1442_v4 = vadd.f32 %v1663_v2, %v1441_v3  ;;  %v1814_v5 = vpop.f32.mrb[33].mxu0 }
 0xd80   : > { %v1444_v6 = vpop.f32.mrb[34].mxu0 }
 0xd81   : > { %v1447_v7 = vmax.f32 %v1442_v4, 0.0  ;;  %v1815_v9 = vpop.f32.mrb[35].mxu0 }
 0xd83   : > { %v1448_v10 = vpack.c.bf16 %v1447_v7, %v1447_v7 }
 0xd85   : > { %1833 = vmatmul.mubr.bf16.vlgmr.msra.gmra.mrb[24].mxu1 %v1448_v10 }
 0xe58   : > { %v1554_v11 = vpop.f32.mrb[24].mxu1 }
 0xe59   : > { %v1555_v12 = vadd.f32 %v1667_v8, %v1554_v11  ;;  %v1834_v13 = vpop.f32.mrb[25].mxu1 }
 0xe5a   : > { %v1557_v14 = vpop.f32.mrb[26].mxu1 }
 0xe5b   : > { %v1560_v15 = vadd.f32 %v1555_v12, %v2162_v40  ;;  %v1835_v16 = vpop.f32.mrb[27].mxu1 }
 0xe5d   : > { %1561 = vst.msk [vmem:[%s533_s29] sm:$0xff] %vm538_vm0, %v1560_v15 }
 0xe5e PF: > { %s26_s21 = sadd.s32 1, %s1893_s21  }
 0xe5f   : > { %p23_p4 = scmp.ge.s32.totalorder %s26_s21, 4  }
 0xe61   :  { %25 = sbr.rel (!%p23_p4) target bundleno = 2 (0x2), region = 120 }

</bundles_post_ra>
